<compile_context>
chip_gen: v7x
topology: tpu7x:2x2x1
jax: 0.10.0
libtpu: 0.0.40
codegen_flags: <defaults>
</compile_context>

<pallas_src>
import functools

import jax
import jax.numpy as jnp
from jax import lax
from jax.experimental import pallas as pl
from jax.experimental.pallas import tpu as pltpu


# ----------------------------- Pallas kernel -------------------------------

def _fused_conv_relu_kernel(x_ref, w1_ref, b1_ref, w2_ref, b2_ref, o_ref,
                            *, h, w, wy, th, cin_p):
    """One (batch, row-block) step of conv3x3+ReLU -> conv3x3+ReLU.

    x_ref  : (h+4, wy+2, cin_p)  padded NHWC image (whole image, VMEM resident)
    w1_ref : (9, cin_p, c1)      conv1 weights, tap-major
    b1_ref : (1, c1)
    w2_ref : (9*c1, c2)          conv2 weights, taps folded into K
    b2_ref : (1, c2)
    o_ref  : (th*w, c2)          lane-dense output rows [r*th, (r+1)*th) flattened
    """
    c1 = w1_ref.shape[-1]
    r = pl.program_id(1)
    rs = r * th                                    # first output row of this block
    row_start = pl.multiple_of(r * th, th)
    xb = x_ref[pl.ds(row_start, th + 4), :, :]     # (th+4, wy+2, cin_p)

    # ---- layer 1: conv3x3(cin->c1) + bias + ReLU ---------------------------
    # Evaluated on (th+2) x wy positions: one halo row above/below and one halo
    # column left/right of this block (plus right-alignment columns that layer
    # 2 never reads), so layer 2 needs no neighbour data.
    m1 = (th + 2) * wy
    acc = jnp.zeros((m1, c1), jnp.float32)
    t = 0
    for dy in range(3):                            # static unrolled 3x3 taps
        for dx in range(3):
            a = xb[dy:dy + th + 2, dx:dx + wy, :].reshape(m1, cin_p)
            acc = acc + jnp.dot(a, w1_ref[t], preferred_element_type=jnp.float32)
            t += 1
    y1 = jnp.maximum(acc + b1_ref[...], 0.0).reshape(th + 2, wy, c1)

    # Positions outside the real image are conv2's zero padding -> zero them.
    row_ids = lax.broadcasted_iota(jnp.int32, y1.shape, 0) + (rs - 1)
    col_ids = lax.broadcasted_iota(jnp.int32, y1.shape, 1) - 1
    valid = (row_ids >= 0) & (row_ids < h) & (col_ids >= 0) & (col_ids < w)
    y1 = jnp.where(valid, y1, 0.0)                 # (th+2, wy, c1), stays in VMEM

    # ---- layer 2: conv3x3(c1->c2) + bias + ReLU ----------------------------
    # Fold the 9 taps into the contraction dim -> one (m2, 576) @ (576, 128)
    # MXU matmul instead of 9 shallow ones.
    m2 = th * w
    taps = []
    for dy in range(3):
        for dx in range(3):
            taps.append(y1[dy:dy + th, dx:dx + w, :].reshape(m2, c1))
    a2 = jnp.concatenate(taps, axis=-1)            # (m2, 9*c1)
    y2 = jnp.dot(a2, w2_ref[...], preferred_element_type=jnp.float32)
    y2 = jnp.maximum(y2 + b2_ref[...], 0.0)        # (m2, c2), bias added once
    o_ref[...] = y2.astype(o_ref.dtype)


# ------------------------------ JAX wrapper --------------------------------

def _round_up(x, m):
    return ((x + m - 1) // m) * m


def _pick_row_tile(h, w, target_pixels=1024):
    """Rows per grid step: divides h, ~target_pixels per block, >1 block if possible."""
    th = max(1, min(h, target_pixels // max(w, 1)))
    while h % th != 0:
        th -= 1
    if th == h and h > 1:                  # keep >=2 grid steps for pipelining/megacore
        th = h // 2
        while h % th != 0:
            th -= 1
    if (th * w) % 8 != 0 and th != h:      # keep the output block sublane-aligned
        th = h
    return th


def feature_extractor_forward(x_nchw, params):
    """Matches FeatureExtractor.forward: NCHW float32 in, NCHW float32 out."""
    w1, b1, w2, b2 = params["w1"], params["b1"], params["w2"], params["b2"]
    n, cin, h, w = x_nchw.shape
    c1 = w1.shape[0]                                   # 64
    c2 = w2.shape[0]                                   # 128
    cin_p = _round_up(max(cin, 8), 8)                  # pad Cin for sublane packing
    wy = _round_up(w + 2, 8)                           # halo'd layer-1 width, aligned
    th = _pick_row_tile(h, w)
    nr = h // th

    # NCHW -> NHWC; zero pad 2 rows top/bottom and (2, wy-w) columns so every
    # halo'd window the kernel reads is in-bounds (extra right columns are
    # alignment padding that is masked / never consumed by layer 2).
    x = jnp.transpose(x_nchw, (0, 2, 3, 1))
    x = jnp.pad(x, ((0, 0), (2, 2), (2, wy - w), (0, cin_p - cin)))
    # x: (n, h+4, wy+2, cin_p)

    # conv1 weights: (c1, cin, 3, 3) -> (9, cin_p, c1), tap-major.
    w1t = jnp.transpose(w1, (2, 3, 1, 0))              # (3, 3, cin, c1)
    w1t = jnp.pad(w1t, ((0, 0), (0, 0), (0, cin_p - cin), (0, 0)))
    w1f = w1t.reshape(9, cin_p, c1)
    # conv2 weights: (c2, c1, 3, 3) -> (9*c1, c2), taps folded into K.
    w2f = jnp.transpose(w2, (2, 3, 1, 0)).reshape(9 * c1, c2)
    b1r = b1.reshape(1, c1)
    b2r = b2.reshape(1, c2)

    kernel = functools.partial(_fused_conv_relu_kernel,
                               h=h, w=w, wy=wy, th=th, cin_p=cin_p)
    out = pl.pallas_call(
        kernel,
        out_shape=jax.ShapeDtypeStruct((n, h * w, c2), x_nchw.dtype),
        grid=(n, nr),
        in_specs=[
            # Whole padded image of batch element i: block index is constant in
            # r, so it stays VMEM resident across the row blocks of one image.
            pl.BlockSpec((None, h + 4, wy + 2, cin_p), lambda i, r: (i, 0, 0, 0)),
            pl.BlockSpec((9, cin_p, c1), lambda i, r: (0, 0, 0)),
            pl.BlockSpec((1, c1), lambda i, r: (0, 0)),
            pl.BlockSpec((9 * c1, c2), lambda i, r: (0, 0)),
            pl.BlockSpec((1, c2), lambda i, r: (0, 0)),
        ],
        out_specs=pl.BlockSpec((None, th * w, c2), lambda i, r: (i, r, 0)),
        compiler_params=pltpu.CompilerParams(
            dimension_semantics=("parallel", "parallel")),
    )(x, w1f, b1r, w2f, b2r)

    out = out.reshape(n, h, w, c2)
    return jnp.transpose(out, (0, 3, 1, 2))            # NHWC -> NCHW


def init_params(key, input_channels=3):
    k1, k2, k3, k4 = jax.random.split(key, 4)
    fan1 = input_channels * 9
    fan2 = 64 * 9
    w1 = jax.random.uniform(k1, (64, input_channels, 3, 3), jnp.float32,
                            -1.0 / jnp.sqrt(fan1), 1.0 / jnp.sqrt(fan1))
    b1 = jax.random.uniform(k2, (64,), jnp.float32,
                            -1.0 / jnp.sqrt(fan1), 1.0 / jnp.sqrt(fan1))
    w2 = jax.random.uniform(k3, (128, 64, 3, 3), jnp.float32,
                            -1.0 / jnp.sqrt(fan2), 1.0 / jnp.sqrt(fan2))
    b2 = jax.random.uniform(k4, (128,), jnp.float32,
                            -1.0 / jnp.sqrt(fan2), 1.0 / jnp.sqrt(fan2))
    return {"w1": w1, "b1": b1, "w2": w2, "b2": b2}


def _reference_forward(x_nchw, params):
    """Pure-JAX reference (lax.conv) for a correctness check."""
    def conv(x, w, b):
        y = lax.conv_general_dilated(
            x, w, window_strides=(1, 1), padding="SAME",
            dimension_numbers=("NCHW", "OIHW", "NCHW"))
        return jnp.maximum(y + b[None, :, None, None], 0.0)
    x = conv(x_nchw, params["w1"], params["b1"])
    x = conv(x, params["w2"], params["b2"])
    return x


if __name__ == "__main__":
    key = jax.random.PRNGKey(0)
    kp, kx = jax.random.split(key)
    params = init_params(kp, input_channels=3)

    # Small deterministic input consistent with the module: N=2, C=3, H=W=16.
    x = jax.random.normal(kx, (2, 3, 16, 16), dtype=jnp.float32)

    out = jax.jit(feature_extractor_forward)(x, params)
    out = jax.block_until_ready(out)
    assert out.shape == (2, 128, 16, 16), out.shape

    ref = _reference_forward(x, params)
    err = float(jnp.max(jnp.abs(out - ref)))
    assert jnp.allclose(out, ref, atol=1e-4, rtol=1e-4), err

    print("KERNEL_OK")
</pallas_src>

<mosaic_0001>
module attributes {stable_mosaic.version = 11 : i64} {
  func.func @_fused_conv_relu_kernel(%arg0: i32, %arg1: i32, %arg2: memref<1x20x26x8xf32, #tpu.memory_space<vmem>>, %arg3: memref<9x8x64xf32, #tpu.memory_space<vmem>>, %arg4: memref<1x64xf32, #tpu.memory_space<vmem>>, %arg5: memref<576x128xf32, #tpu.memory_space<vmem>>, %arg6: memref<1x128xf32, #tpu.memory_space<vmem>>, %arg7: memref<1x128x128xf32, #tpu.memory_space<vmem>>) attributes {dimension_semantics = [#tpu.dimension_semantics<parallel>, #tpu.dimension_semantics<parallel>], iteration_bounds = array<i64: 2, 2>, scalar_prefetch = 0 : i64, scratch_operands = 0 : i64, tpu.core_type = #tpu.core_type<tc>, window_params = [{transform_indices = @transform_0, window_bounds = array<i64: 1, 20, 26, 8>}, {pipeline_mode = #tpu.pipeline_mode<synchronous>, transform_indices = @transform_1, window_bounds = array<i64: 9, 8, 64>}, {pipeline_mode = #tpu.pipeline_mode<synchronous>, transform_indices = @transform_2, window_bounds = array<i64: 1, 64>}, {pipeline_mode = #tpu.pipeline_mode<synchronous>, transform_indices = @transform_3, window_bounds = array<i64: 576, 128>}, {pipeline_mode = #tpu.pipeline_mode<synchronous>, transform_indices = @transform_4, window_bounds = array<i64: 1, 128>}, {transform_indices = @transform_5, window_bounds = array<i64: 1, 128, 128>}]} {
    %c8_i32 = arith.constant 8 : i32
    %0 = arith.muli %arg1, %c8_i32 : i32
    %c8_i32_0 = arith.constant 8 : i32
    %1 = arith.muli %arg1, %c8_i32_0 : i32
    %2 = tpu.assume_multiple %1, 8 : i32
    %c0 = arith.constant 0 : index
    %3 = arith.index_cast %2 : i32 to index
    %c0_1 = arith.constant 0 : index
    %c0_2 = arith.constant 0 : index
    %4 = vector.load %arg2[%c0, %3, %c0_1, %c0_2] : memref<1x20x26x8xf32, #tpu.memory_space<vmem>>, vector<1x12x26x8xf32>
    %5 = vector.shape_cast %4 : vector<1x12x26x8xf32> to vector<12x26x8xf32>
    %cst = arith.constant 0.000000e+00 : f32
    %6 = vector.broadcast %cst : f32 to vector<240x64xf32>
    %7 = vector.extract_strided_slice %5 {offsets = [0, 0, 0], sizes = [10, 24, 8], strides = [1, 1, 1]} : vector<12x26x8xf32> to vector<10x24x8xf32>
    %8 = vector.shape_cast %7 : vector<10x24x8xf32> to vector<240x8xf32>
    %c0_3 = arith.constant 0 : index
    %c0_4 = arith.constant 0 : index
    %c0_5 = arith.constant 0 : index
    %9 = vector.load %arg3[%c0_3, %c0_4, %c0_5] : memref<9x8x64xf32, #tpu.memory_space<vmem>>, vector<1x8x64xf32>
    %10 = vector.shape_cast %9 : vector<1x8x64xf32> to vector<8x64xf32>
    %cst_6 = arith.constant dense<0.000000e+00> : vector<240x64xf32>
    %11 = tpu.matmul %8, %10, %cst_6 {dimension_numbers = #tpu.dot_dimension_numbers<[1], [0], [0], [1], [0, 0, 1, 1], [], []>} : vector<240x8xf32>, vector<8x64xf32>, vector<240x64xf32> -> vector<240x64xf32>
    %12 = arith.addf %6, %11 : vector<240x64xf32>
    %13 = vector.extract_strided_slice %5 {offsets = [0, 1, 0], sizes = [10, 24, 8], strides = [1, 1, 1]} : vector<12x26x8xf32> to vector<10x24x8xf32>
    %14 = vector.shape_cast %13 : vector<10x24x8xf32> to vector<240x8xf32>
    %c1 = arith.constant 1 : index
    %c0_7 = arith.constant 0 : index
    %c0_8 = arith.constant 0 : index
    %15 = vector.load %arg3[%c1, %c0_7, %c0_8] : memref<9x8x64xf32, #tpu.memory_space<vmem>>, vector<1x8x64xf32>
    %16 = vector.shape_cast %15 : vector<1x8x64xf32> to vector<8x64xf32>
    %cst_9 = arith.constant dense<0.000000e+00> : vector<240x64xf32>
    %17 = tpu.matmul %14, %16, %cst_9 {dimension_numbers = #tpu.dot_dimension_numbers<[1], [0], [0], [1], [0, 0, 1, 1], [], []>} : vector<240x8xf32>, vector<8x64xf32>, vector<240x64xf32> -> vector<240x64xf32>
    %18 = arith.addf %12, %17 : vector<240x64xf32>
    %19 = vector.extract_strided_slice %5 {offsets = [0, 2, 0], sizes = [10, 24, 8], strides = [1, 1, 1]} : vector<12x26x8xf32> to vector<10x24x8xf32>
    %20 = vector.shape_cast %19 : vector<10x24x8xf32> to vector<240x8xf32>
    %c2 = arith.constant 2 : index
    %c0_10 = arith.constant 0 : index
    %c0_11 = arith.constant 0 : index
    %21 = vector.load %arg3[%c2, %c0_10, %c0_11] : memref<9x8x64xf32, #tpu.memory_space<vmem>>, vector<1x8x64xf32>
    %22 = vector.shape_cast %21 : vector<1x8x64xf32> to vector<8x64xf32>
    %cst_12 = arith.constant dense<0.000000e+00> : vector<240x64xf32>
    %23 = tpu.matmul %20, %22, %cst_12 {dimension_numbers = #tpu.dot_dimension_numbers<[1], [0], [0], [1], [0, 0, 1, 1], [], []>} : vector<240x8xf32>, vector<8x64xf32>, vector<240x64xf32> -> vector<240x64xf32>
    %24 = arith.addf %18, %23 : vector<240x64xf32>
    %25 = vector.extract_strided_slice %5 {offsets = [1, 0, 0], sizes = [10, 24, 8], strides = [1, 1, 1]} : vector<12x26x8xf32> to vector<10x24x8xf32>
    %26 = vector.shape_cast %25 : vector<10x24x8xf32> to vector<240x8xf32>
    %c3 = arith.constant 3 : index
    %c0_13 = arith.constant 0 : index
    %c0_14 = arith.constant 0 : index
    %27 = vector.load %arg3[%c3, %c0_13, %c0_14] : memref<9x8x64xf32, #tpu.memory_space<vmem>>, vector<1x8x64xf32>
    %28 = vector.shape_cast %27 : vector<1x8x64xf32> to vector<8x64xf32>
    %cst_15 = arith.constant dense<0.000000e+00> : vector<240x64xf32>
    %29 = tpu.matmul %26, %28, %cst_15 {dimension_numbers = #tpu.dot_dimension_numbers<[1], [0], [0], [1], [0, 0, 1, 1], [], []>} : vector<240x8xf32>, vector<8x64xf32>, vector<240x64xf32> -> vector<240x64xf32>
    %30 = arith.addf %24, %29 : vector<240x64xf32>
    %31 = vector.extract_strided_slice %5 {offsets = [1, 1, 0], sizes = [10, 24, 8], strides = [1, 1, 1]} : vector<12x26x8xf32> to vector<10x24x8xf32>
    %32 = vector.shape_cast %31 : vector<10x24x8xf32> to vector<240x8xf32>
    %c4 = arith.constant 4 : index
    %c0_16 = arith.constant 0 : index
    %c0_17 = arith.constant 0 : index
    %33 = vector.load %arg3[%c4, %c0_16, %c0_17] : memref<9x8x64xf32, #tpu.memory_space<vmem>>, vector<1x8x64xf32>
    %34 = vector.shape_cast %33 : vector<1x8x64xf32> to vector<8x64xf32>
    %cst_18 = arith.constant dense<0.000000e+00> : vector<240x64xf32>
    %35 = tpu.matmul %32, %34, %cst_18 {dimension_numbers = #tpu.dot_dimension_numbers<[1], [0], [0], [1], [0, 0, 1, 1], [], []>} : vector<240x8xf32>, vector<8x64xf32>, vector<240x64xf32> -> vector<240x64xf32>
    %36 = arith.addf %30, %35 : vector<240x64xf32>
    %37 = vector.extract_strided_slice %5 {offsets = [1, 2, 0], sizes = [10, 24, 8], strides = [1, 1, 1]} : vector<12x26x8xf32> to vector<10x24x8xf32>
    %38 = vector.shape_cast %37 : vector<10x24x8xf32> to vector<240x8xf32>
    %c5 = arith.constant 5 : index
    %c0_19 = arith.constant 0 : index
    %c0_20 = arith.constant 0 : index
    %39 = vector.load %arg3[%c5, %c0_19, %c0_20] : memref<9x8x64xf32, #tpu.memory_space<vmem>>, vector<1x8x64xf32>
    %40 = vector.shape_cast %39 : vector<1x8x64xf32> to vector<8x64xf32>
    %cst_21 = arith.constant dense<0.000000e+00> : vector<240x64xf32>
    %41 = tpu.matmul %38, %40, %cst_21 {dimension_numbers = #tpu.dot_dimension_numbers<[1], [0], [0], [1], [0, 0, 1, 1], [], []>} : vector<240x8xf32>, vector<8x64xf32>, vector<240x64xf32> -> vector<240x64xf32>
    %42 = arith.addf %36, %41 : vector<240x64xf32>
    %43 = vector.extract_strided_slice %5 {offsets = [2, 0, 0], sizes = [10, 24, 8], strides = [1, 1, 1]} : vector<12x26x8xf32> to vector<10x24x8xf32>
    %44 = vector.shape_cast %43 : vector<10x24x8xf32> to vector<240x8xf32>
    %c6 = arith.constant 6 : index
    %c0_22 = arith.constant 0 : index
    %c0_23 = arith.constant 0 : index
    %45 = vector.load %arg3[%c6, %c0_22, %c0_23] : memref<9x8x64xf32, #tpu.memory_space<vmem>>, vector<1x8x64xf32>
    %46 = vector.shape_cast %45 : vector<1x8x64xf32> to vector<8x64xf32>
    %cst_24 = arith.constant dense<0.000000e+00> : vector<240x64xf32>
    %47 = tpu.matmul %44, %46, %cst_24 {dimension_numbers = #tpu.dot_dimension_numbers<[1], [0], [0], [1], [0, 0, 1, 1], [], []>} : vector<240x8xf32>, vector<8x64xf32>, vector<240x64xf32> -> vector<240x64xf32>
    %48 = arith.addf %42, %47 : vector<240x64xf32>
    %49 = vector.extract_strided_slice %5 {offsets = [2, 1, 0], sizes = [10, 24, 8], strides = [1, 1, 1]} : vector<12x26x8xf32> to vector<10x24x8xf32>
    %50 = vector.shape_cast %49 : vector<10x24x8xf32> to vector<240x8xf32>
    %c7 = arith.constant 7 : index
    %c0_25 = arith.constant 0 : index
    %c0_26 = arith.constant 0 : index
    %51 = vector.load %arg3[%c7, %c0_25, %c0_26] : memref<9x8x64xf32, #tpu.memory_space<vmem>>, vector<1x8x64xf32>
    %52 = vector.shape_cast %51 : vector<1x8x64xf32> to vector<8x64xf32>
    %cst_27 = arith.constant dense<0.000000e+00> : vector<240x64xf32>
    %53 = tpu.matmul %50, %52, %cst_27 {dimension_numbers = #tpu.dot_dimension_numbers<[1], [0], [0], [1], [0, 0, 1, 1], [], []>} : vector<240x8xf32>, vector<8x64xf32>, vector<240x64xf32> -> vector<240x64xf32>
    %54 = arith.addf %48, %53 : vector<240x64xf32>
    %55 = vector.extract_strided_slice %5 {offsets = [2, 2, 0], sizes = [10, 24, 8], strides = [1, 1, 1]} : vector<12x26x8xf32> to vector<10x24x8xf32>
    %56 = vector.shape_cast %55 : vector<10x24x8xf32> to vector<240x8xf32>
    %c8 = arith.constant 8 : index
    %c0_28 = arith.constant 0 : index
    %c0_29 = arith.constant 0 : index
    %57 = vector.load %arg3[%c8, %c0_28, %c0_29] : memref<9x8x64xf32, #tpu.memory_space<vmem>>, vector<1x8x64xf32>
    %58 = vector.shape_cast %57 : vector<1x8x64xf32> to vector<8x64xf32>
    %cst_30 = arith.constant dense<0.000000e+00> : vector<240x64xf32>
    %59 = tpu.matmul %56, %58, %cst_30 {dimension_numbers = #tpu.dot_dimension_numbers<[1], [0], [0], [1], [0, 0, 1, 1], [], []>} : vector<240x8xf32>, vector<8x64xf32>, vector<240x64xf32> -> vector<240x64xf32>
    %60 = arith.addf %54, %59 : vector<240x64xf32>
    %c0_31 = arith.constant 0 : index
    %c0_32 = arith.constant 0 : index
    %61 = vector.load %arg4[%c0_31, %c0_32] : memref<1x64xf32, #tpu.memory_space<vmem>>, vector<1x64xf32>
    %62 = vector.broadcast %61 : vector<1x64xf32> to vector<240x64xf32>
    %63 = arith.addf %60, %62 : vector<240x64xf32>
    %cst_33 = arith.constant 0.000000e+00 : f32
    %64 = vector.broadcast %cst_33 : f32 to vector<240x64xf32>
    %65 = arith.maximumf %63, %64 : vector<240x64xf32>
    %66 = vector.shape_cast %65 : vector<240x64xf32> to vector<10x24x64xf32>
    %67 = tpu.iota {dimensions = array<i32: 0>} : vector<10x24x64xi32>
    %c1_i32 = arith.constant 1 : i32
    %68 = arith.subi %0, %c1_i32 : i32
    %69 = vector.broadcast %68 : i32 to vector<10x24x64xi32>
    %70 = arith.addi %67, %69 : vector<10x24x64xi32>
    %71 = tpu.iota {dimensions = array<i32: 1>} : vector<10x24x64xi32>
    %c1_i32_34 = arith.constant 1 : i32
    %72 = vector.broadcast %c1_i32_34 : i32 to vector<10x24x64xi32>
    %73 = arith.subi %71, %72 : vector<10x24x64xi32>
    %c0_i32 = arith.constant 0 : i32
    %74 = vector.broadcast %c0_i32 : i32 to vector<10x24x64xi32>
    %75 = arith.cmpi sge, %70, %74 : vector<10x24x64xi32>
    %c16_i32 = arith.constant 16 : i32
    %76 = vector.broadcast %c16_i32 : i32 to vector<10x24x64xi32>
    %77 = arith.cmpi slt, %70, %76 : vector<10x24x64xi32>
    %78 = arith.andi %75, %77 : vector<10x24x64xi1>
    %c0_i32_35 = arith.constant 0 : i32
    %79 = vector.broadcast %c0_i32_35 : i32 to vector<10x24x64xi32>
    %80 = arith.cmpi sge, %73, %79 : vector<10x24x64xi32>
    %81 = arith.andi %78, %80 : vector<10x24x64xi1>
    %c16_i32_36 = arith.constant 16 : i32
    %82 = vector.broadcast %c16_i32_36 : i32 to vector<10x24x64xi32>
    %83 = arith.cmpi slt, %73, %82 : vector<10x24x64xi32>
    %84 = arith.andi %81, %83 : vector<10x24x64xi1>
    %cst_37 = arith.constant 0.000000e+00 : f32
    %85 = vector.broadcast %cst_37 : f32 to vector<10x24x64xf32>
    %86 = arith.select %84, %66, %85 : vector<10x24x64xi1>, vector<10x24x64xf32>
    %87 = vector.extract_strided_slice %86 {offsets = [0, 0, 0], sizes = [8, 16, 64], strides = [1, 1, 1]} : vector<10x24x64xf32> to vector<8x16x64xf32>
    %88 = vector.shape_cast %87 : vector<8x16x64xf32> to vector<128x64xf32>
    %89 = vector.extract_strided_slice %86 {offsets = [0, 1, 0], sizes = [8, 16, 64], strides = [1, 1, 1]} : vector<10x24x64xf32> to vector<8x16x64xf32>
    %90 = vector.shape_cast %89 : vector<8x16x64xf32> to vector<128x64xf32>
    %91 = vector.extract_strided_slice %86 {offsets = [0, 2, 0], sizes = [8, 16, 64], strides = [1, 1, 1]} : vector<10x24x64xf32> to vector<8x16x64xf32>
    %92 = vector.shape_cast %91 : vector<8x16x64xf32> to vector<128x64xf32>
    %93 = vector.extract_strided_slice %86 {offsets = [1, 0, 0], sizes = [8, 16, 64], strides = [1, 1, 1]} : vector<10x24x64xf32> to vector<8x16x64xf32>
    %94 = vector.shape_cast %93 : vector<8x16x64xf32> to vector<128x64xf32>
    %95 = vector.extract_strided_slice %86 {offsets = [1, 1, 0], sizes = [8, 16, 64], strides = [1, 1, 1]} : vector<10x24x64xf32> to vector<8x16x64xf32>
    %96 = vector.shape_cast %95 : vector<8x16x64xf32> to vector<128x64xf32>
    %97 = vector.extract_strided_slice %86 {offsets = [1, 2, 0], sizes = [8, 16, 64], strides = [1, 1, 1]} : vector<10x24x64xf32> to vector<8x16x64xf32>
    %98 = vector.shape_cast %97 : vector<8x16x64xf32> to vector<128x64xf32>
    %99 = vector.extract_strided_slice %86 {offsets = [2, 0, 0], sizes = [8, 16, 64], strides = [1, 1, 1]} : vector<10x24x64xf32> to vector<8x16x64xf32>
    %100 = vector.shape_cast %99 : vector<8x16x64xf32> to vector<128x64xf32>
    %101 = vector.extract_strided_slice %86 {offsets = [2, 1, 0], sizes = [8, 16, 64], strides = [1, 1, 1]} : vector<10x24x64xf32> to vector<8x16x64xf32>
    %102 = vector.shape_cast %101 : vector<8x16x64xf32> to vector<128x64xf32>
    %103 = vector.extract_strided_slice %86 {offsets = [2, 2, 0], sizes = [8, 16, 64], strides = [1, 1, 1]} : vector<10x24x64xf32> to vector<8x16x64xf32>
    %104 = vector.shape_cast %103 : vector<8x16x64xf32> to vector<128x64xf32>
    %105 = tpu.concatenate %88, %90, %92, %94, %96, %98, %100, %102, %104 in 1 : vector<128x64xf32>, vector<128x64xf32>, vector<128x64xf32>, vector<128x64xf32>, vector<128x64xf32>, vector<128x64xf32>, vector<128x64xf32>, vector<128x64xf32>, vector<128x64xf32> -> vector<128x576xf32>
    %c0_38 = arith.constant 0 : index
    %c0_39 = arith.constant 0 : index
    %106 = vector.load %arg5[%c0_38, %c0_39] : memref<576x128xf32, #tpu.memory_space<vmem>>, vector<576x128xf32>
    %cst_40 = arith.constant dense<0.000000e+00> : vector<128x128xf32>
    %107 = tpu.matmul %105, %106, %cst_40 {dimension_numbers = #tpu.dot_dimension_numbers<[1], [0], [0], [1], [0, 0, 1, 1], [], []>} : vector<128x576xf32>, vector<576x128xf32>, vector<128x128xf32> -> vector<128x128xf32>
    %c0_41 = arith.constant 0 : index
    %c0_42 = arith.constant 0 : index
    %108 = vector.load %arg6[%c0_41, %c0_42] : memref<1x128xf32, #tpu.memory_space<vmem>>, vector<1x128xf32>
    %109 = vector.broadcast %108 : vector<1x128xf32> to vector<128x128xf32>
    %110 = arith.addf %107, %109 : vector<128x128xf32>
    %cst_43 = arith.constant 0.000000e+00 : f32
    %111 = vector.broadcast %cst_43 : f32 to vector<128x128xf32>
    %112 = arith.maximumf %110, %111 : vector<128x128xf32>
    %c0_44 = arith.constant 0 : index
    %c0_45 = arith.constant 0 : index
    %c0_46 = arith.constant 0 : index
    %113 = vector.load %arg7[%c0_44, %c0_45, %c0_46] : memref<1x128x128xf32, #tpu.memory_space<vmem>>, vector<1x128x128xf32>
    %114 = vector.shape_cast %113 : vector<1x128x128xf32> to vector<128x128xf32>
    %115 = vector.shape_cast %112 : vector<128x128xf32> to vector<1x128x128xf32>
    tpu.vector_store %arg7[%c0_44, %c0_45, %c0_46], %115 {strides = array<i32>} : memref<1x128x128xf32, #tpu.memory_space<vmem>>, vector<1x128x128xf32>,
    return
  }
  func.func @transform_0(%arg0: i32, %arg1: i32) -> (i32, i32, i32, i32) {
    %c0_i32 = arith.constant 0 : i32
    %c0_i32_0 = arith.constant 0 : i32
    %c0_i32_1 = arith.constant 0 : i32
    %c0_i32_2 = arith.constant 0 : i32
    return %arg0, %c0_i32, %c0_i32_0, %c0_i32_1 : i32, i32, i32, i32
  }
  func.func @transform_1(%arg0: i32, %arg1: i32) -> (i32, i32, i32) {
    %c0_i32 = arith.constant 0 : i32
    %c0_i32_0 = arith.constant 0 : i32
    %c0_i32_1 = arith.constant 0 : i32
    %c0_i32_2 = arith.constant 0 : i32
    return %c0_i32, %c0_i32_0, %c0_i32_1 : i32, i32, i32
  }
  func.func @transform_2(%arg0: i32, %arg1: i32) -> (i32, i32) {
    %c0_i32 = arith.constant 0 : i32
    %c0_i32_0 = arith.constant 0 : i32
    %c0_i32_1 = arith.constant 0 : i32
    return %c0_i32, %c0_i32_0 : i32, i32
  }
  func.func @transform_3(%arg0: i32, %arg1: i32) -> (i32, i32) {
    %c0_i32 = arith.constant 0 : i32
    %c0_i32_0 = arith.constant 0 : i32
    %c0_i32_1 = arith.constant 0 : i32
    return %c0_i32, %c0_i32_0 : i32, i32
  }
  func.func @transform_4(%arg0: i32, %arg1: i32) -> (i32, i32) {
    %c0_i32 = arith.constant 0 : i32
    %c0_i32_0 = arith.constant 0 : i32
    %c0_i32_1 = arith.constant 0 : i32
    return %c0_i32, %c0_i32_0 : i32, i32
  }
  func.func @transform_5(%arg0: i32, %arg1: i32) -> (i32, i32, i32) {
    %c0_i32 = arith.constant 0 : i32
    %c0_i32_0 = arith.constant 0 : i32
    return %arg0, %arg1, %c0_i32 : i32, i32, i32
  }
}

</mosaic_0001>

<bundles_post_ra>
// kernel: feature_extractor_forward.1
= control target key start
LH: loop header
LB: loop body
LE: loop exit
PB: predicated region body
PF: predicated region fallthrough
CT: control target
= control target key end

     0   :  { %10 = vsyncpa [#allocation3], 0  ;;  %s8288_s0 = inlined_call_operand.vmem [shape: f32[2,20,26,8], index: 0, kind: input, shape index: {}]   ;;  %s8289_s1 = inlined_call_operand.vmem [shape: f32[9,8,64], index: 1, kind: input, shape index: {}]   ;;  %s8290_s2 = inlined_call_operand.vmem [shape: f32[1,64], index: 2, kind: input, shape index: {}]   ;;  %s8291_s3 = inlined_call_operand.vmem [shape: f32[576,128], index: 3, kind: input, shape index: {}]   ;;  %s8292_s4 = inlined_call_operand.vmem [shape: f32[1,128], index: 4, kind: input, shape index: {}]   ;;  %s8293_s5 = inlined_call_operand.hbm [shape: f32[2,256,128], index: 5, kind: output, shape index: {}]  }
   0x1   :  { %12 = vsyncpa [#allocation3 + $0x1], 0  ;;  %s6007_s18 = smov 0   ;;  %s6009_s19 = smov 0  }
   0x2   :  { %s6011_s20 = smov 0   ;;  %s6013_s21 = smov 0  }
   0x3   :  { %s6015_s22 = smov 0   ;;  %s6017_s23 = smov 0  }
   0x4   :  { %s6019_s24 = smov 0   ;;  %s6021_s25 = smov 0  }
   0x5 LB: > { %s4140_s26 = sadd.s32 4294967295, %s5971_s25   ;;  %s4141_s27 = sadd.s32 4294967294, %s5971_s25   ;;  %s5971_s25 = sphi %s6021_s25, %s18_s25   ;;  %s5967_s24 = sphi %s6019_s24, %s8458_s24   ;;  %s5963_s23 = sphi %s6017_s23, %s8457_s23   ;;  %s5959_s22 = sphi %s6015_s22, %s8456_s22   ;;  %s5955_s21 = sphi %s6013_s21, %s8455_s21   ;;  %s5951_s20 = sphi %s6011_s20, %s8454_s20   ;;  %s5947_s19 = sphi %s6009_s19, %s8453_s19   ;;  %s5943_s18 = sphi %s6007_s18, %s8452_s18  }
   0x6   : > { %s27_s28 = sadd.s32 1, %s5963_s23  ;;  %s30_s29 = sadd.s32 1, %s5967_s24 }
   0x7   : > { %p28_p0 = scmp.ge.s32.totalorder %s27_s28, 2  ;;  %p159_p1 = scmp.ne.s32.totalorder %s5951_s20, %s5947_s19 }
   0x8   : > { %p160_p2 = scmp.eq.s32.totalorder %s4140_s26, 3  ;;  %p165_p5 = scmp.ne.s32.totalorder %s5947_s19, %s5943_s18 }
   0x9   : > { %s8460_s28 = smov (%p28_p0, %s27_s28), 0  ;;  %s8462_s29 = smov (!%p28_p0, %s30_s29), %s5967_s24 }
   0xa   : > { %s145_s30 = ssub.s32 %s5963_s23, %s8460_s28  ;;  %p6058_p3 = por %p160_p2, %p159_p1 }
   0xb   : > { %p32_p4 = scmp.ge.s32.totalorder %s8462_s29, 2  ;;  %p166_p6 = scmp.eq.s32.totalorder %s4141_s27, 3 }
   0xc   : > { %p4144_p7 = scmp.ge.s32.totalorder %s5971_s25, 1  ;;  %p204_p9 = scmp.lt.s32.totalorder %s5971_s25, 5 }
   0xd   : > { %s8464_s29 = smov (%p32_p4, %s8462_s29), 0  ;;  %p6067_p8 = por %p166_p6, %p165_p5 }
   0xe   : > { %s144_s8 = ssub.s32 %s5967_s24, %s8464_s29  ;;  %s149_s9 = sadd.s32 1, %s5951_s20 }
   0xf   : > { %s146_s10 = sor.u32 %s145_s30, %s144_s8  ;;  %p205_p10 = pnand %p4144_p7, %p204_p9 }
  0x10   : > { %p147_p11 = scmp.eq.s32.totalorder %s146_s10, 0 }
  0x11   : > { %208 = sbr.rel (%p205_p10) target bundleno = 1067 (0x42b), region = 40 }
  0x12   : > { %s6076_s11 = scalar_select %p147_p11, %s5951_s20, %s149_s9  }
  0x18   : > { %v4241_v0 = vld [vmem:[%s8289_s1 + $0x18] sm:$0xff]  ;;  %p232_p12 = scmp.lt.s32.totalorder %s5959_s22, 1  ;;  %v4272_v1 = vld [vmem:[%s8289_s1 + $0x20] sm:$0xff]  ;;  %v4149_v2 = vld [vmem:[%s8289_s1 + $0x8] sm:$0xff]  ;;  %s4455_s9 = sshll.u32 %s5955_s21, 8  ;;  %vm403_vm0 = vcmask 64512  }
  0x19   : > { %5060 = vmatprep.subr.mxu0 %v4241_v0  ;;  %4919 = vmatprep.subr.mxu1 %v4149_v2  ;;  %v289_v3 = vld [vmem:[%s8289_s1] sm:$0xff]  ;;  %v6112_v7 = vld [vmem:[%s8289_s1 + $0x28] sm:$0xff]  ;;  %vm330_vm1 = vcmask 1046528   ;;  %vm954_vm2 = vcmask 1045504   ;;  %s4450_s10 = sshll.u32 %s5955_s21, 4  ;;  %s4451_s12 = sshll.u32 %s5959_s22, 5 }
  0x1a   : > { %5061 = vmatpush3.msra.mxu0 %v4241_v0  ;;  %s233_s30 = scalar_select %p232_p12, %s5959_s22, 1  ;;  %4920 = vmatpush3.msra.mxu1 %v4149_v2 }
  0x1b   : > { %5107 = vmatprep.subr.mxu0 %v4272_v1  ;;  %4966 = vmatprep.subr.mxu1 %v289_v3  ;;  %s5974_s27 = smov [#allocation2]  }
  0x1c   : > { %s5702_s8 = smul.u32 640, %s233_s30  ;;  %s229_s30 = sand.u32 1, %s5947_s19  }
  0x1d   : > { %s8236_s17 = scalar_lea.sflag [#allocation3], %s229_s30 }
  0x1e   : > { %s236_s13 = scalar_lea.vmem %s8288_s0, %s5702_s8  ;;  %s4145_s8 = sshll.u32 %s229_s30, 7 }
  0x1f   : > { %s6096_s14 = scalar_lea.vmem %s236_s13, %s4455_s9  ;;  %s4147_s13 = sshll.u32 %s5955_s21, 3 }
  0x20   : > { %v6099_v4 = vld [vmem:[%s6096_s14 + $0x20] sm:$0xff]  ;;  %v6102_v5 = vld [vmem:[%s6096_s14 + $0x28] sm:$0xff]  ;;  %v6105_v6 = vld [vmem:[%s6096_s14 + $0x30] sm:$0xff]  ;;  %s8193_s9 = scalar_lea.vmem [#allocation2], %s4145_s8  ;;  %s5881_s8 = sshll.u32 %s5974_s27, 4  ;;  %s5882_s8 = int_to_ptr.vmem [resolvable:$false] %s5881_s8 }
  0x21   : > { %5062 = vmatprep.mubr.msk.f32.mxu0 %vm403_vm0, %v6099_v4  ;;  %v6119_v8 = vld [vmem:[%s6096_s14 + $0x40] sm:$0xff]  ;;  %v6122_v9 = vld [vmem:[%s6096_s14 + $0x48] sm:$0xff]  ;;  %v6130_v10 = vld [vmem:[%s6096_s14 + $0x50] sm:$0xff]  ;;  %v338_v24 = vrot.slane %v6099_v4, 1  ;;  %v339_v25 = vrot.slane %v6102_v5, 1  ;;  %v341_v28 = vrot.slane %v6105_v6, 1 }
  0x22   : > { %5063 = vmatmul.mubr.msk.f32.vlgmr.msra.gmra.mrb[0].mxu0 %vm403_vm0, %v6102_v5  ;;  %v6133_v11 = vld [vmem:[%s6096_s14 + $0x60] sm:$0xff]  ;;  %v6143_v13 = vld [vmem:[%s6096_s14 + $0x68] sm:$0xff]  ;;  %v6150_v16 = vld [vmem:[%s6096_s14 + $0x10] sm:$0xff]  ;;  %v345_v36 = vrot.slane %v6119_v8, 1  ;;  %v346_v37 = vrot.slane %v6122_v9, 1  ;;  %v348_v41 = vrot.slane %v6130_v10, 1 }
  0x23   : > { %5108 = vmatpush3.msra.mxu0 %v4272_v1  ;;  %5065 = vmatprep.mubr.msk.f32.mxu0 %vm403_vm0, %v6105_v6  ;;  %v6138_v12 = vld [vmem:[%s6096_s14] sm:$0xff]  ;;  %v6146_v14 = vld [vmem:[%s6096_s14 + $0x8] sm:$0xff]  ;;  %v6153_v17 = vld [vmem:[%s6096_s14 + $0x70] sm:$0xff]  ;;  %v334_v19 = vrot.slane %v6150_v16, 1  ;;  %v6191_v32 = vsel %vm330_vm1, %v338_v24, %v339_v25  ;;  %v6198_v35 = vsel %vm330_vm1, %v339_v25, %v341_v28  ;;  %v352_v47 = vrot.slane %v6133_v11, 1  ;;  %s4062_s22 = sshll.u32 %s8193_s9, 4  ;;  %s8230_s22 = int_to_ptr.vmem [resolvable:$true] %s4062_s22 }
  0x24   : > { %5154 = vmatprep.subr.mxu0 %v6112_v7  ;;  %v331_v15 = vrot.slane %v6138_v12, 1  ;;  %v332_v18 = vrot.slane %v6146_v14, 1  ;;  %v6158_v20 = vld [vmem:[%s6096_s14 + $0x18] sm:$0x3]  ;;  %v6170_v26 = vld [vmem:[%s6096_s14 + $0x80] sm:$0xff]  ;;  %v6176_v29 = vld [vmem:[%s6096_s14 + $0x88] sm:$0xff]  ;;  %v6224_v43 = vsel %vm330_vm1, %v345_v36, %v346_v37  ;;  %v6239_v46 = vsel %vm330_vm1, %v346_v37, %v348_v41  ;;  %p5884_p2 = scmp.lt.s32.totalorder %s8230_s22, %s5882_s8 }
  0x25   : > { %8339 = vst [vmem:[#allocation5_spill] sm:$0xff] %v6158_v20  ;;  %v336_v21 = vrot.slane %v6158_v20, 1  ;;  %v6180_v30 = vld [vmem:[%s6096_s14 + $0x38] sm:$0x3]  ;;  %v6188_v31 = vld [vmem:[%s6096_s14 + $0x90] sm:$0xff]  ;;  %v6195_v34 = vld [vmem:[%s6096_s14 + $0xa0] sm:$0xff] }
  0x26   : > { %5066 = vmatmul.mubr.msk.f32.gmra.mrb[2].mxu0 %vm403_vm0, %v6119_v8  ;;  %v333_v22 = vsel %vm330_vm1, %v331_v15, %v332_v18  ;;  %v335_v23 = vsel %vm330_vm1, %v332_v18, %v334_v19  ;;  %v343_v33 = vrot.slane %v6180_v30, 1  ;;  %v6207_v38 = vld [vmem:[%s6096_s14 + $0x58] sm:$0x3]  ;;  %v6214_v39 = vld [vmem:[%s6096_s14 + $0xa8] sm:$0xff]  ;;  %v6221_v42 = vld [vmem:[%s6096_s14 + $0xb0] sm:$0xff]  ;;  %v353_v48 = vrot.slane %v6143_v13, 1 }
  0x27   : > { %5068 = vmatprep.mubr.msk.f32.mxu0 %vm403_vm0, %v6122_v9  ;;  %4921 = vmatprep.mubr.msk.f32.mxu1 %vm403_vm0, %v333_v22  ;;  %v337_v27 = vsel %vm330_vm1, %v334_v19, %v336_v21  ;;  %8340 = vst [vmem:[#allocation6_spill] sm:$0xff] %v6207_v38  ;;  %v350_v44 = vrot.slane %v6207_v38, 1  ;;  %v6236_v45 = vld [vmem:[%s6096_s14 + $0xc0] sm:$0xff]  ;;  %v6244_v49 = vld [vmem:[%s6096_s14 + $0xc8] sm:$0xff]  ;;  %v355_v51 = vrot.slane %v6153_v17, 1  ;;  %v6262_v53 = vld [vmem:[%s6096_s14 + $0xd0] sm:$0xff] }
  0x28   : > { %4922 = vmatmul.mubr.msk.f32.vlgmr.msra.gmra.mrb[0].mxu1 %vm403_vm0, %v335_v23  ;;  %v6217_v40 = vsel %vm330_vm1, %v341_v28, %v343_v33  ;;  %v6253_v52 = vld [vmem:[%s6096_s14 + $0x78] sm:$0x3]  ;;  %v6265_v54 = vsel %vm330_vm1, %v352_v47, %v353_v48  ;;  %v6269_v56 = vld [vmem:[%s6096_s14 + $0xe0] sm:$0xff]  ;;  %v359_v58 = vrot.slane %v6170_v26, 1  ;;  %v360_v59 = vrot.slane %v6176_v29, 1  ;;  %v6288_v61 = vld [vmem:[%s6096_s14 + $0xe8] sm:$0xff] }
  0x29   : > { %4924 = vmatprep.mubr.msk.f32.mxu1 %vm403_vm0, %v337_v27  ;;  %4967 = vmatpush3.msra.mxu1 %v289_v3  ;;  %v6247_v50 = vsel %vm330_vm1, %v348_v41, %v350_v44  ;;  %8341 = vst [vmem:[#allocation7_spill] sm:$0xff] %v6253_v52  ;;  %v357_v55 = vrot.slane %v6253_v52, 1  ;;  %v6272_v57 = vsel %vm330_vm1, %v353_v48, %v355_v51  ;;  %v6281_v60 = vld [vmem:[%s6096_s14 + $0x98] sm:$0x3]  ;;  %v362_v63 = vrot.slane %v6188_v31, 1  ;;  %v6295_v0 = vld [vmem:[%s6096_s14 + $0xf0] sm:$0xff] }
  0x2a   : > { %5069 = vmatmul.mubr.msk.f32.gmra.mrb[4].mxu0 %vm403_vm0, %v6130_v10  ;;  %8342 = vst [vmem:[#allocation8_spill] sm:$0xff] %v6281_v60  ;;  %v6298_v1 = vsel %vm330_vm1, %v359_v58, %v360_v59  ;;  %v364_v2 = vrot.slane %v6281_v60, 1  ;;  %v6310_v3 = vld [vmem:[%s6096_s14 + $0x100] sm:$0xff]  ;;  %v366_v18 = vrot.slane %v6195_v34, 1  ;;  %v367_v19 = vrot.slane %v6214_v39, 1  ;;  %v6318_v21 = vld [vmem:[%s6096_s14 + $0x108] sm:$0xff] }
  0x2b   : > { %5071 = vmatprep.mubr.msk.f32.mxu0 %vm403_vm0, %v6133_v11  ;;  %v6291_v62 = vsel %vm330_vm1, %v355_v51, %v357_v55  ;;  %v6313_v15 = vsel %vm330_vm1, %v360_v59, %v362_v63  ;;  %8343 = vst [vmem:[#allocation9_spill] sm:$0xff] %v6318_v21  ;;  %v369_v23 = vrot.slane %v6221_v42, 1  ;;  %v6327_v24 = vld [vmem:[%s6096_s14 + $0xb8] sm:$0x3]  ;;  %v6336_v25 = vld [vmem:[%s6096_s14 + $0x110] sm:$0xff]  ;;  %v6343_v33 = vld [vmem:[%s6096_s14 + $0x120] sm:$0xff] }
  0x2c   : > { %4925 = vmatmul.mubr.msk.f32.gmra.mrb[2].mxu1 %vm403_vm0, %v6191_v32  ;;  %v6321_v22 = vsel %vm330_vm1, %v362_v63, %v364_v2  ;;  %8344 = vst [vmem:[#allocation10_spill] sm:$0xff] %v6327_v24  ;;  %8345 = vst [vmem:[#allocation11_spill] sm:$0xff] %v6336_v25  ;;  %v6339_v27 = vsel %vm330_vm1, %v366_v18, %v367_v19  ;;  %v371_v28 = vrot.slane %v6327_v24, 1  ;;  %v373_v37 = vrot.slane %v6236_v45, 1  ;;  %v6355_v44 = vld [vmem:[%s6096_s14 + $0xd8] sm:$0x3] }
  0x2d   : > { %4927 = vmatprep.mubr.msk.f32.mxu1 %vm403_vm0, %v6198_v35  ;;  %v6346_v36 = vsel %vm330_vm1, %v367_v19, %v369_v23  ;;  %v374_v41 = vrot.slane %v6244_v49, 1  ;;  %8346 = vst [vmem:[#allocation12_spill] sm:$0xff] %v6355_v44  ;;  %v6362_v47 = vld [vmem:[%s6096_s14 + $0x128] sm:$0xff]  ;;  %v376_v51 = vrot.slane %v6262_v53, 1  ;;  %v6369_v55 = vld [vmem:[%s6096_s14 + $0x130] sm:$0xff]  ;;  %v378_v59 = vrot.slane %v6355_v44, 1 }
  0x2e   : > { %5072 = vmatmul.mubr.msk.f32.gmra.mrb[6].mxu0 %vm403_vm0, %v6143_v13  ;;  %v6365_v48 = vsel %vm330_vm1, %v369_v23, %v371_v28  ;;  %v955_v63 = vrot.slane %v6138_v12, 2  ;;  %v8298_v2 = vrot.slane %v6146_v14, 2  ;;  %v4210_v18 = vld [vmem:[%s8289_s1 + $0x10] sm:$0xff]  ;;  %v6389_v19 = vld [vmem:[%s6096_s14 + $0x140] sm:$0xff]  ;;  %v380_v28 = vrot.slane %v6269_v56, 1  ;;  %v6402_v24 = vld [vmem:[%s6096_s14 + $0x148] sm:$0xff] }
  0x2f   : > { %5074 = vmatprep.mubr.msk.f32.mxu0 %vm403_vm0, %v6153_v17  ;;  %8347 = vst [vmem:[#allocation13_spill] sm:$0xff] %v6365_v48  ;;  %v6372_v58 = vsel %vm330_vm1, %v373_v37, %v374_v41  ;;  %v6392_v23 = vsel %vm330_vm1, %v374_v41, %v376_v51  ;;  %v381_v37 = vrot.slane %v6288_v61, 1  ;;  %5013 = vmatprep.subr.mxu1 %v4210_v18  ;;  %v383_v41 = vrot.slane %v6295_v0, 1  ;;  %v6411_v20 = vld [vmem:[%s6096_s14 + $0xf8] sm:$0x3]  ;;  %s5877_s26 = scalar_lea.vmem %s8230_s22, 2048 }
  0x30   : > { %4928 = vmatmul.mubr.msk.f32.gmra.mrb[4].mxu1 %vm403_vm0, %v6217_v40  ;;  %8348 = vst [vmem:[#allocation14_spill] sm:$0xff] %v6372_v58  ;;  %8349 = vst [vmem:[#allocation15_spill] sm:$0xff] %v6392_v23  ;;  %v6399_v44 = vsel %vm954_vm2, %v955_v63, %v8298_v2  ;;  %v6405_v60 = vsel %vm330_vm1, %v376_v51, %v378_v59  ;;  %v6420_v63 = vld [vmem:[%s6096_s14 + $0x150] sm:$0xff]  ;;  %v385_v59 = vrot.slane %v6411_v20, 1  ;;  %v388_v52 = vrot.slane %v6318_v21, 1  ;;  %p5878_p13 = scmp.ne.s32.totalorder %s8230_s22, %s5877_s26 }
  0x31   : > { %4930 = vmatprep.mubr.msk.f32.mxu1 %vm403_vm0, %v6224_v43  ;;  %8350 = vst [vmem:[#allocation16_spill] sm:$0xff] %v6399_v44  ;;  %8351 = vst [vmem:[#allocation17_spill] sm:$0xff] %v6405_v60  ;;  %v6423_v51 = vsel %vm330_vm1, %v380_v28, %v381_v37  ;;  %v6427_v2 = vsel %vm330_vm1, %v381_v37, %v383_v41  ;;  %v387_v44 = vrot.slane %v6310_v3, 1  ;;  %v6436_v38 = vld [vmem:[%s6096_s14 + $0x118] sm:$0x3]  ;;  %v390_v37 = vrot.slane %v6336_v25, 1 }
  0x32   : > { %5075 = vmatmul.mubr.msk.f32.gmra.mrb[8].mxu0 %vm403_vm0, %v6170_v26  ;;  %8352 = vst [vmem:[#allocation18_spill] sm:$0xff] %v6411_v20  ;;  %8353 = vst [vmem:[#allocation19_spill] sm:$0xff] %v6423_v51  ;;  %v6443_v28 = vsel %vm330_vm1, %v383_v41, %v385_v59  ;;  %v394_v41 = vrot.slane %v6343_v33, 1  ;;  %v395_v59 = vrot.slane %v6362_v47, 1  ;;  %p5879_p0 = pnand %p5878_p13, %p6058_p3 }
  0x33   : > { %5077 = vmatprep.mubr.msk.f32.mxu0 %vm403_vm0, %v6176_v29  ;;  %8354 = vst [vmem:[#allocation20_spill] sm:$0xff] %v6427_v2  ;;  %8355 = vst [vmem:[#allocation21_spill] sm:$0xff] %v6436_v38  ;;  %v6447_v20 = vsel %vm330_vm1, %v387_v44, %v388_v52  ;;  %v6465_v44 = vsel %vm330_vm1, %v388_v52, %v390_v37 }
  0x34   : > { %4931 = vmatmul.mubr.msk.f32.gmra.mrb[6].mxu1 %vm403_vm0, %v6239_v46  ;;  %8356 = vst [vmem:[#allocation22_spill] sm:$0xff] %v6443_v28  ;;  %8357 = vst [vmem:[#allocation23_spill] sm:$0xff] %v6447_v20  ;;  %p5880_p1 = pneg %p5879_p0 }
  0x35   : > { %4933 = vmatprep.mubr.msk.f32.mxu1 %vm403_vm0, %v6247_v50  ;;  %8358 = vst [vmem:[#allocation24_spill] sm:$0xff] %v6465_v44 }
  0x36   : > { %5078 = vmatmul.mubr.msk.f32.gmra.mrb[10].mxu0 %vm403_vm0, %v6188_v31 }
  0x37   : > { %5080 = vmatprep.mubr.msk.f32.mxu0 %vm403_vm0, %v6195_v34 }
  0x38   : > { %4934 = vmatmul.mubr.msk.f32.gmra.mrb[8].mxu1 %vm403_vm0, %v6265_v54 }
  0x39   : > { %4936 = vmatprep.mubr.msk.f32.mxu1 %vm403_vm0, %v6272_v57 }
  0x3a   : > { %5081 = vmatmul.mubr.msk.f32.gmra.mrb[12].mxu0 %vm403_vm0, %v6214_v39 }
  0x3b   : > { %5083 = vmatprep.mubr.msk.f32.mxu0 %vm403_vm0, %v6221_v42 }
  0x3c   : > { %4937 = vmatmul.mubr.msk.f32.gmra.mrb[10].mxu1 %vm403_vm0, %v6291_v62 }
  0x3d   : > { %4939 = vmatprep.mubr.msk.f32.mxu1 %vm403_vm0, %v6298_v1 }
  0x3e   : > { %5084 = vmatmul.mubr.msk.f32.gmra.mrb[14].mxu0 %vm403_vm0, %v6236_v45 }
  0x3f   : > { %5086 = vmatprep.mubr.msk.f32.mxu0 %vm403_vm0, %v6244_v49 }
  0x40   : > { %4940 = vmatmul.mubr.msk.f32.gmra.mrb[12].mxu1 %vm403_vm0, %v6313_v15 }
  0x41   : > { %4942 = vmatprep.mubr.msk.f32.mxu1 %vm403_vm0, %v6321_v22 }
  0x42   : > { %5087 = vmatmul.mubr.msk.f32.gmra.mrb[16].mxu0 %vm403_vm0, %v6262_v53 }
  0x43   : > { %5089 = vmatprep.mubr.msk.f32.mxu0 %vm403_vm0, %v6269_v56 }
  0x44   : > { %4943 = vmatmul.mubr.msk.f32.gmra.mrb[14].mxu1 %vm403_vm0, %v6339_v27 }
  0x45   : > { %4945 = vmatprep.mubr.msk.f32.mxu1 %vm403_vm0, %v6346_v36 }
  0x46   : > { %5090 = vmatmul.mubr.msk.f32.gmra.mrb[18].mxu0 %vm403_vm0, %v6288_v61 }
  0x47   : > { %5092 = vmatprep.mubr.msk.f32.mxu0 %vm403_vm0, %v6295_v0 }
  0x48   : > { %4946 = vmatmul.mubr.msk.f32.gmra.mrb[16].mxu1 %vm403_vm0, %v6365_v48 }
  0x49   : > { %4948 = vmatprep.mubr.msk.f32.mxu1 %vm403_vm0, %v6372_v58 }
  0x4a   : > { %5093 = vmatmul.mubr.msk.f32.gmra.mrb[20].mxu0 %vm403_vm0, %v6310_v3 }
  0x4b   : > { %5095 = vmatprep.mubr.msk.f32.mxu0 %vm403_vm0, %v6318_v21  ;;  %v392_v21 = vrot.slane %v6436_v38, 1 }
  0x4c   : > { %4949 = vmatmul.mubr.msk.f32.gmra.mrb[18].mxu1 %vm403_vm0, %v6392_v23 }
  0x4d   : > { %4951 = vmatprep.mubr.msk.f32.mxu1 %vm403_vm0, %v6405_v60  ;;  %v6470_v38 = vsel %vm330_vm1, %v390_v37, %v392_v21  ;;  %v1592_v37 = vrot.slane %v6420_v63, 1 }
  0x4e   : > { %5096 = vmatmul.mubr.msk.f32.gmra.mrb[22].mxu0 %vm403_vm0, %v6336_v25  ;;  %8359 = vst [vmem:[#allocation25_spill] sm:$0xff] %v6470_v38  ;;  %v6476_v25 = vld [vmem:[%s6096_s14 + $0x138] sm:$0x3] }
  0x4f   : > { %5098 = vmatprep.mubr.msk.f32.mxu0 %vm403_vm0, %v6343_v33 }
  0x50   : > { %4952 = vmatmul.mubr.msk.f32.gmra.mrb[20].mxu1 %vm403_vm0, %v6423_v51 }
  0x51   : > { %4954 = vmatprep.mubr.msk.f32.mxu1 %vm403_vm0, %v6427_v2 }
  0x52   : > { %5099 = vmatmul.mubr.msk.f32.gmra.mrb[24].mxu0 %vm403_vm0, %v6362_v47 }
  0x53   : > { %5101 = vmatprep.mubr.msk.f32.mxu0 %vm403_vm0, %v6369_v55 }
  0x54   : > { %4955 = vmatmul.mubr.msk.f32.gmra.mrb[22].mxu1 %vm403_vm0, %v6443_v28 }
  0x55   : > { %4957 = vmatprep.mubr.msk.f32.mxu1 %vm403_vm0, %v6447_v20 }
  0x56   : > { %5102 = vmatmul.mubr.msk.f32.gmra.mrb[26].mxu0 %vm403_vm0, %v6389_v19 }
  0x57   : > { %5104 = vmatprep.mubr.msk.f32.mxu0 %vm403_vm0, %v6402_v24 }
  0x58   : > { %4958 = vmatmul.mubr.msk.f32.gmra.mrb[24].mxu1 %vm403_vm0, %v6465_v44 }
  0x59   : > { %4960 = vmatprep.mubr.msk.f32.mxu1 %vm403_vm0, %v6470_v38 }
  0x5a   : > { %5105 = vmatmul.mubr.msk.f32.gmra.mrb[28].mxu0 %vm403_vm0, %v6420_v63 }
  0x5b   : > { %5109 = vmatprep.mubr.msk.f32.mxu0 %vm403_vm0, %v6191_v32  ;;  %v6457_v32 = vld [vmem:[%s8289_s1 + $0x30] sm:$0xff] }
  0x5e   : > { %5110 = vmatmul.mubr.msk.f32.vlgmr.msra.gmra.mrb[0].mxu0 %vm403_vm0, %v6198_v35  ;;  %v397_v35 = vrot.slane %v6369_v55, 1 }
  0x5f   : > { %5155 = vmatpush3.msra.mxu0 %v6112_v7  ;;  %5112 = vmatprep.mubr.msk.f32.mxu0 %vm403_vm0, %v6217_v40  ;;  %v6486_v7 = vsel %vm330_vm1, %v394_v41, %v395_v59  ;;  %v399_v40 = vrot.slane %v6476_v25, 1  ;;  %v6579_v41 = vld [vmem:[%s6096_s14 + $0x158] sm:$0x3] }
  0x60   : > { %5201 = vmatprep.subr.mxu0 %v6457_v32  ;;  %8360 = vst [vmem:[#allocation26_spill] sm:$0xff] %v6486_v7  ;;  %v6490_v52 = vsel %vm330_vm1, %v395_v59, %v397_v35  ;;  %4961 = vmatmul.mubr.msk.f32.gmra.mrb[26].mxu1 %vm403_vm0, %v6486_v7 }
  0x61   : > { %8361 = vst [vmem:[#allocation27_spill] sm:$0xff] %v6490_v52  ;;  %4963 = vmatprep.mubr.msk.f32.mxu1 %vm403_vm0, %v6490_v52  ;;  %v6501_v21 = vsel %vm330_vm1, %v397_v35, %v399_v40  ;;  %v1594_v35 = vrot.slane %v6579_v41, 1  ;;  %v962_v40 = vrot.slane %v6099_v4, 2 }
  0x62   : > { %5113 = vmatmul.mubr.msk.f32.gmra.mrb[2].mxu0 %vm403_vm0, %v6224_v43  ;;  %8362 = vst [vmem:[#allocation28_spill] sm:$0xff] %v6501_v21 }
  0x63   : > { %5115 = vmatprep.mubr.msk.f32.mxu0 %vm403_vm0, %v6239_v46 }
  0x64   : > { %4964 = vmatmul.mubr.msk.f32.gmra.mrb[28].mxu1 %vm403_vm0, %v6501_v21 }
  0x65   : > { %4968 = vmatprep.mubr.msk.f32.mxu1 %vm403_vm0, %v6138_v12  ;;  %v1589_v12 = vrot.slane %v6389_v19, 1 }
  0x66   : > { %5116 = vmatmul.mubr.msk.f32.gmra.mrb[4].mxu0 %vm403_vm0, %v6247_v50 }
  0x67   : > { %5118 = vmatprep.mubr.msk.f32.mxu0 %vm403_vm0, %v6265_v54 }
  0x68   : > { %4969 = vmatmul.mubr.msk.f32.vlgmr.msra.gmra.mrb[0].mxu1 %vm403_vm0, %v6146_v14 }
  0x69   : > { %4971 = vmatprep.mubr.msk.f32.mxu1 %vm403_vm0, %v6150_v16  ;;  %5014 = vmatpush3.msra.mxu1 %v4210_v18  ;;  %v1590_v18 = vrot.slane %v6402_v24, 1 }
  0x6a   : > { %5119 = vmatmul.mubr.msk.f32.gmra.mrb[6].mxu0 %vm403_vm0, %v6272_v57 }
  0x6b   : > { %5121 = vmatprep.mubr.msk.f32.mxu0 %vm403_vm0, %v6291_v62  ;;  %v6590_v59 = vsel %vm330_vm1, %v1589_v12, %v1590_v18  ;;  %v965_v12 = vrot.slane %v6105_v6, 2 }
  0x6c   : > { %4972 = vmatmul.mubr.msk.f32.gmra.mrb[2].mxu1 %vm403_vm0, %v6099_v4  ;;  %8363 = vst [vmem:[#allocation29_spill] sm:$0xff] %v6590_v59  ;;  %v6608_v4 = vsel %vm330_vm1, %v1592_v37, %v1594_v35  ;;  %v970_v35 = vrot.slane %v6122_v9, 2 }
  0x6d   : > { %4974 = vmatprep.mubr.msk.f32.mxu1 %vm403_vm0, %v6102_v5  ;;  %8365 = vst [vmem:[#allocation31_spill] sm:$0xff] %v6608_v4 }
  0x6e   : > { %5122 = vmatmul.mubr.msk.f32.gmra.mrb[8].mxu0 %vm403_vm0, %v6298_v1 }
  0x6f   : > { %5124 = vmatprep.mubr.msk.f32.mxu0 %vm403_vm0, %v6313_v15 }
  0x70   : > { %4975 = vmatmul.mubr.msk.f32.gmra.mrb[4].mxu1 %vm403_vm0, %v6105_v6 }
  0x71   : > { %4977 = vmatprep.mubr.msk.f32.mxu1 %vm403_vm0, %v6119_v8 }
  0x72   : > { %5125 = vmatmul.mubr.msk.f32.gmra.mrb[10].mxu0 %vm403_vm0, %v6321_v22 }
  0x73   : > { %5127 = vmatprep.mubr.msk.f32.mxu0 %vm403_vm0, %v6339_v27 }
  0x74   : > { %4978 = vmatmul.mubr.msk.f32.gmra.mrb[6].mxu1 %vm403_vm0, %v6122_v9 }
  0x75   : > { %4980 = vmatprep.mubr.msk.f32.mxu1 %vm403_vm0, %v6130_v10 }
  0x76   : > { %5128 = vmatmul.mubr.msk.f32.gmra.mrb[12].mxu0 %vm403_vm0, %v6346_v36 }
  0x77   : > { %5130 = vmatprep.mubr.msk.f32.mxu0 %vm403_vm0, %v6365_v48 }
  0x78   : > { %4981 = vmatmul.mubr.msk.f32.gmra.mrb[8].mxu1 %vm403_vm0, %v6133_v11 }
  0x79   : > { %4983 = vmatprep.mubr.msk.f32.mxu1 %vm403_vm0, %v6143_v13 }
  0x7a   : > { %5131 = vmatmul.mubr.msk.f32.gmra.mrb[14].mxu0 %vm403_vm0, %v6372_v58 }
  0x7b   : > { %5133 = vmatprep.mubr.msk.f32.mxu0 %vm403_vm0, %v6392_v23 }
  0x7c   : > { %4984 = vmatmul.mubr.msk.f32.gmra.mrb[10].mxu1 %vm403_vm0, %v6153_v17 }
  0x7d   : > { %4986 = vmatprep.mubr.msk.f32.mxu1 %vm403_vm0, %v6170_v26 }
  0x7e   : > { %5134 = vmatmul.mubr.msk.f32.gmra.mrb[16].mxu0 %vm403_vm0, %v6405_v60  ;;  %v8375_v60 = vld [vmem:[#allocation16_spill] sm:$0xff] }
  0x7f   : > { %5136 = vmatprep.mubr.msk.f32.mxu0 %vm403_vm0, %v6423_v51  ;;  %v986_v51 = vrot.slane %v6188_v31, 2 }
  0x80   : > { %4987 = vmatmul.mubr.msk.f32.gmra.mrb[12].mxu1 %vm403_vm0, %v6176_v29 }
  0x81   : > { %4989 = vmatprep.mubr.msk.f32.mxu1 %vm403_vm0, %v6188_v31 }
  0x82   : > { %5137 = vmatmul.mubr.msk.f32.gmra.mrb[18].mxu0 %vm403_vm0, %v6427_v2  ;;  %v984_v2 = vrot.slane %v6176_v29, 2 }
  0x83   : > { %5139 = vmatprep.mubr.msk.f32.mxu0 %vm403_vm0, %v6443_v28  ;;  %v958_v28 = vrot.slane %v6150_v16, 2 }
  0x84   : > { %4990 = vmatmul.mubr.msk.f32.gmra.mrb[14].mxu1 %vm403_vm0, %v6195_v34  ;;  %v6698_v48 = vsel %vm954_vm2, %v984_v2, %v986_v51 }
  0x85   : > { %4992 = vmatprep.mubr.msk.f32.mxu1 %vm403_vm0, %v6214_v39 }
  0x86   : > { %5140 = vmatmul.mubr.msk.f32.gmra.mrb[20].mxu0 %vm403_vm0, %v6447_v20 }
  0x87   : > { %5142 = vmatprep.mubr.msk.f32.mxu0 %vm403_vm0, %v6465_v44  ;;  %v8371_v44 = vld [vmem:[#allocation7_spill] sm:$0xff] }
  0x88   : > { %4993 = vmatmul.mubr.msk.f32.gmra.mrb[16].mxu1 %vm403_vm0, %v6221_v42  ;;  %v981_v20 = vrot.slane %v8371_v44, 2  ;;  %v983_v44 = vrot.slane %v6170_v26, 2 }
  0x89   : > { %4995 = vmatprep.mubr.msk.f32.mxu1 %vm403_vm0, %v6236_v45 }
  0x8a   : > { %5143 = vmatmul.mubr.msk.f32.gmra.mrb[22].mxu0 %vm403_vm0, %v6470_v38  ;;  %v6596_v38 = vsel %vm330_vm1, %v1590_v18, %v1592_v37  ;;  %v967_v18 = vrot.slane %v6180_v30, 2  ;;  %v969_v37 = vrot.slane %v6119_v8, 2  ;;  %v972_v30 = vrot.slane %v6130_v10, 2 }
  0x8b   : > { %5145 = vmatprep.mubr.msk.f32.mxu0 %vm403_vm0, %v6486_v7  ;;  %v963_v7 = vrot.slane %v6102_v5, 2  ;;  %8364 = vst [vmem:[#allocation30_spill] sm:$0xff] %v6596_v38 }
  0x8c   : > { %4996 = vmatmul.mubr.msk.f32.gmra.mrb[18].mxu1 %vm403_vm0, %v6244_v49 }
  0x8d   : > { %4998 = vmatprep.mubr.msk.f32.mxu1 %vm403_vm0, %v6262_v53  ;;  %v964_v5 = vsel %vm954_vm2, %v962_v40, %v963_v7  ;;  %v966_v6 = vsel %vm954_vm2, %v963_v7, %v965_v12  ;;  %v968_v40 = vsel %vm954_vm2, %v965_v12, %v967_v18  ;;  %v6637_v7 = vsel %vm954_vm2, %v969_v37, %v970_v35  ;;  %v8366_v12 = vld [vmem:[#allocation6_spill] sm:$0xff] }
  0x8e   : > { %5146 = vmatmul.mubr.msk.f32.gmra.mrb[24].mxu0 %vm403_vm0, %v6490_v52  ;;  %v974_v18 = vrot.slane %v8366_v12, 2  ;;  %v8367_v52 = vld [vmem:[#allocation9_spill] sm:$0xff] }
  0x8f   : > { %5148 = vmatprep.mubr.msk.f32.mxu0 %vm403_vm0, %v6501_v21  ;;  %v977_v21 = vrot.slane %v6143_v13, 2 }
  0x90   : > { %4999 = vmatmul.mubr.msk.f32.gmra.mrb[20].mxu1 %vm403_vm0, %v6269_v56  ;;  %v6655_v37 = vsel %vm954_vm2, %v972_v30, %v974_v18 }
  0x91   : > { %5001 = vmatprep.mubr.msk.f32.mxu1 %vm403_vm0, %v6288_v61  ;;  %8369 = vst [vmem:[#allocation6_spill] sm:$0xff] %v6655_v37 }
  0x92   : > { %5149 = vmatmul.mubr.msk.f32.gmra.mrb[26].mxu0 %vm403_vm0, %v6590_v59  ;;  %v976_v59 = vrot.slane %v6133_v11, 2 }
  0x93   : > { %5151 = vmatprep.mubr.msk.f32.mxu0 %vm403_vm0, %v6596_v38  ;;  %v6641_v38 = vsel %vm954_vm2, %v970_v35, %v972_v30  ;;  %v979_v35 = vrot.slane %v6153_v17, 2  ;;  %v8372_v30 = vld [vmem:[#allocation5_spill] sm:$0xff] }
  0x94   : > { %5002 = vmatmul.mubr.msk.f32.gmra.mrb[22].mxu1 %vm403_vm0, %v6295_v0  ;;  %v6659_v12 = vsel %vm954_vm2, %v976_v59, %v977_v21  ;;  %v960_v18 = vrot.slane %v8372_v30, 2  ;;  %v8376_v30 = vrot.slane %v6146_v14, 2  ;;  %v990_v14 = vrot.slane %v6195_v34, 2 }
  0x95   : > { %5004 = vmatprep.mubr.msk.f32.mxu1 %vm403_vm0, %v6310_v3  ;;  %8370 = vst [vmem:[#allocation9_spill] sm:$0xff] %v6659_v12  ;;  %v6673_v59 = vsel %vm954_vm2, %v977_v21, %v979_v35  ;;  %v6678_v16 = vsel %vm954_vm2, %v979_v35, %v981_v20  ;;  %v6694_v20 = vsel %vm954_vm2, %v983_v44, %v984_v2  ;;  %v8378_v35 = vld [vmem:[#allocation8_spill] sm:$0xff]  ;;  %v993_v2 = vrot.slane %v6221_v42, 2  ;;  %v8380_v44 = vld [vmem:[#allocation10_spill] sm:$0xff] }
  0x96   : > { %5152 = vmatmul.mubr.msk.f32.gmra.mrb[28].mxu0 %vm403_vm0, %v6608_v4  ;;  %v6631_v4 = vld [vmem:[%s8289_s1 + $0x38] sm:$0xff]  ;;  %8374 = vst [vmem:[#allocation7_spill] sm:$0xff] %v6678_v16  ;;  %v959_v21 = vsel %vm954_vm2, %v8376_v30, %v958_v28  ;;  %v961_v23 = vsel %vm954_vm2, %v958_v28, %v960_v18  ;;  %8377 = vst [vmem:[#allocation5_spill] sm:$0xff] %v6694_v20  ;;  %v988_v58 = vrot.slane %v8378_v35, 2  ;;  %v995_v30 = vrot.slane %v8380_v44, 2 }
  0x97   : > { %5156 = vmatprep.mubr.msk.f32.mxu0 %vm403_vm0, %v964_v5  ;;  %v8382_v35 = vld [vmem:[#allocation12_spill] sm:$0xff] }
  0x98   : > { %5005 = vmatmul.mubr.msk.f32.gmra.mrb[24].mxu1 %vm403_vm0, %v8367_v52  ;;  %v6709_v28 = vsel %vm954_vm2, %v986_v51, %v988_v58  ;;  %v998_v51 = vrot.slane %v6244_v49, 2 }
  0x99   : > { %8379 = vst [vmem:[#allocation16_spill] sm:$0xff] %v6709_v28 }
  0x9a   : > { %5157 = vmatmul.mubr.msk.f32.vlgmr.msra.gmra.mrb[0].mxu0 %vm403_vm0, %v966_v6 }
  0x9b   : > { %5202 = vmatpush3.msra.mxu0 %v6457_v32  ;;  %5159 = vmatprep.mubr.msk.f32.mxu0 %vm403_vm0, %v968_v40  ;;  %v8368_v32 = vld [vmem:[#allocation11_spill] sm:$0xff] }
  0x9c   : > { %5248 = vmatprep.subr.mxu0 %v6631_v4  ;;  %5007 = vmatprep.mubr.msk.f32.mxu1 %vm403_vm0, %v8368_v32  ;;  %8373 = vst [vmem:[#allocation11_spill] sm:$0xff] %v6673_v59 }
  0x9d   : > { %5008 = vmatmul.mubr.msk.f32.gmra.mrb[26].mxu1 %vm403_vm0, %v6343_v33 }
  0x9e   : > { %5160 = vmatmul.mubr.msk.f32.gmra.mrb[2].mxu0 %vm403_vm0, %v6637_v7  ;;  %5010 = vmatprep.mubr.msk.f32.mxu1 %vm403_vm0, %v6362_v47 }
  0x9f   : > { %5162 = vmatprep.mubr.msk.f32.mxu0 %vm403_vm0, %v6641_v38 }
  0xa1   : > { %5011 = vmatmul.mubr.msk.f32.gmra.mrb[28].mxu1 %vm403_vm0, %v6369_v55 }
  0xa2   : > { %5163 = vmatmul.mubr.msk.f32.gmra.mrb[4].mxu0 %vm403_vm0, %v6655_v37  ;;  %5015 = vmatprep.mubr.msk.f32.mxu1 %vm403_vm0, %v8375_v60  ;;  %v991_v60 = vrot.slane %v6214_v39, 2 }
  0xa3   : > { %5165 = vmatprep.mubr.msk.f32.mxu0 %vm403_vm0, %v6659_v12 }
  0xa4   : > { %v6713_v18 = vsel %vm954_vm2, %v990_v14, %v991_v60  ;;  %v6723_v58 = vsel %vm954_vm2, %v991_v60, %v993_v2  ;;  %v1002_v14 = vrot.slane %v8382_v35, 2 }
  0xa5   : > { %5016 = vmatmul.mubr.msk.f32.vlgmr.msra.gmra.mrb[0].mxu1 %vm403_vm0, %v959_v21  ;;  %8381 = vst [vmem:[#allocation8_spill] sm:$0xff] %v6723_v58  ;;  %v6728_v21 = vsel %vm954_vm2, %v993_v2, %v995_v30  ;;  %v1004_v2 = vrot.slane %v6269_v56, 2  ;;  %v1007_v30 = vrot.slane %v6295_v0, 2 }
  0xa6   : > { %5166 = vmatmul.mubr.msk.f32.gmra.mrb[6].mxu0 %vm403_vm0, %v6673_v59  ;;  %5018 = vmatprep.mubr.msk.f32.mxu1 %vm403_vm0, %v961_v23  ;;  %v997_v23 = vrot.slane %v6236_v45, 2 }
  0xa7   : > { %5168 = vmatprep.mubr.msk.f32.mxu0 %vm403_vm0, %v6678_v16 }
  0xa9   : > { %5019 = vmatmul.mubr.msk.f32.gmra.mrb[2].mxu1 %vm403_vm0, %v964_v5  ;;  %v1000_v5 = vrot.slane %v6262_v53, 2 }
  0xaa   : > { %5169 = vmatmul.mubr.msk.f32.gmra.mrb[8].mxu0 %vm403_vm0, %v6694_v20  ;;  %5021 = vmatprep.mubr.msk.f32.mxu1 %vm403_vm0, %v966_v6  ;;  %v6739_v6 = vsel %vm954_vm2, %v997_v23, %v998_v51 }
  0xab   : > { %5171 = vmatprep.mubr.msk.f32.mxu0 %vm403_vm0, %v6698_v48  ;;  %v6743_v60 = vsel %vm954_vm2, %v998_v51, %v1000_v5  ;;  %v6756_v44 = vsel %vm954_vm2, %v1000_v5, %v1002_v14  ;;  %v8383_v51 = vld [vmem:[#allocation18_spill] sm:$0xff]  ;;  %v1011_v14 = vrot.slane %v6310_v3, 2 }
  0xac   : > { %v1009_v35 = vrot.slane %v8383_v51, 2 }
  0xad   : > { %5022 = vmatmul.mubr.msk.f32.gmra.mrb[4].mxu1 %vm403_vm0, %v968_v40  ;;  %v1005_v40 = vrot.slane %v6288_v61, 2 }
  0xae   : > { %5172 = vmatmul.mubr.msk.f32.gmra.mrb[10].mxu0 %vm403_vm0, %v6709_v28  ;;  %5024 = vmatprep.mubr.msk.f32.mxu1 %vm403_vm0, %v6637_v7  ;;  %v6777_v51 = vsel %vm954_vm2, %v1007_v30, %v1009_v35 }
  0xaf   : > { %5174 = vmatprep.mubr.msk.f32.mxu0 %vm403_vm0, %v6713_v18  ;;  %v6760_v23 = vsel %vm954_vm2, %v1004_v2, %v1005_v40  ;;  %v6772_v5 = vsel %vm954_vm2, %v1005_v40, %v1007_v30  ;;  %v1012_v2 = vrot.slane %v8367_v52, 2 }
  0xb1   : > { %5025 = vmatmul.mubr.msk.f32.gmra.mrb[6].mxu1 %vm403_vm0, %v6641_v38  ;;  %v6789_v40 = vsel %vm954_vm2, %v1011_v14, %v1012_v2  ;;  %v1021_v14 = vrot.slane %v6369_v55, 2 }
  0xb2   : > { %5175 = vmatmul.mubr.msk.f32.gmra.mrb[12].mxu0 %vm403_vm0, %v6723_v58  ;;  %5027 = vmatprep.mubr.msk.f32.mxu1 %vm403_vm0, %v6655_v37  ;;  %v1018_v37 = vrot.slane %v6343_v33, 2 }
  0xb3   : > { %5177 = vmatprep.mubr.msk.f32.mxu0 %vm403_vm0, %v6728_v21 }
  0xb5   : > { %5028 = vmatmul.mubr.msk.f32.gmra.mrb[8].mxu1 %vm403_vm0, %v6659_v12  ;;  %v1014_v12 = vrot.slane %v8368_v32, 2 }
  0xb6   : > { %5178 = vmatmul.mubr.msk.f32.gmra.mrb[14].mxu0 %vm403_vm0, %v6739_v6  ;;  %5030 = vmatprep.mubr.msk.f32.mxu1 %vm403_vm0, %v6673_v59  ;;  %v8384_v59 = vld [vmem:[#allocation21_spill] sm:$0xff] }
  0xb7   : > { %5180 = vmatprep.mubr.msk.f32.mxu0 %vm403_vm0, %v6743_v60  ;;  %v1016_v30 = vrot.slane %v8384_v59, 2  ;;  %v6793_v35 = vsel %vm954_vm2, %v1012_v2, %v1014_v12 }
  0xb9   : > { %5031 = vmatmul.mubr.msk.f32.gmra.mrb[10].mxu1 %vm403_vm0, %v6678_v16  ;;  %v1019_v16 = vrot.slane %v6362_v47, 2  ;;  %v6806_v59 = vsel %vm954_vm2, %v1014_v12, %v1016_v30  ;;  %v1850_v12 = vrot.slane %v6402_v24, 2 }
  0xba   : > { %5181 = vmatmul.mubr.msk.f32.gmra.mrb[16].mxu0 %vm403_vm0, %v6756_v44  ;;  %5033 = vmatprep.mubr.msk.f32.mxu1 %vm403_vm0, %v6694_v20  ;;  %v1023_v20 = vrot.slane %v6476_v25, 2  ;;  %v1852_v25 = vrot.slane %v6420_v63, 2 }
  0xbb   : > { %5183 = vmatprep.mubr.msk.f32.mxu0 %vm403_vm0, %v6760_v23  ;;  %v6810_v2 = vsel %vm954_vm2, %v1018_v37, %v1019_v16  ;;  %v6824_v37 = vsel %vm954_vm2, %v1019_v16, %v1021_v14 }
  0xbc   : > { %v6828_v30 = vsel %vm954_vm2, %v1021_v14, %v1023_v20  ;;  %v6843_v20 = vsel %vm954_vm2, %v1850_v12, %v1852_v25 }
  0xbd   : > { %5034 = vmatmul.mubr.msk.f32.gmra.mrb[12].mxu1 %vm403_vm0, %v6698_v48 }
  0xbe   : > { %5184 = vmatmul.mubr.msk.f32.gmra.mrb[18].mxu0 %vm403_vm0, %v6772_v5  ;;  %5036 = vmatprep.mubr.msk.f32.mxu1 %vm403_vm0, %v6709_v28  ;;  %v1849_v28 = vrot.slane %v6389_v19, 2 }
  0xbf   : > { %5186 = vmatprep.mubr.msk.f32.mxu0 %vm403_vm0, %v6777_v51 }
  0xc0   : > { %v6839_v16 = vsel %vm954_vm2, %v1849_v28, %v1850_v12 }
  0xc1   : > { %5037 = vmatmul.mubr.msk.f32.gmra.mrb[14].mxu1 %vm403_vm0, %v6713_v18 }
  0xc2   : > { %5187 = vmatmul.mubr.msk.f32.gmra.mrb[20].mxu0 %vm403_vm0, %v6789_v40  ;;  %5039 = vmatprep.mubr.msk.f32.mxu1 %vm403_vm0, %v6723_v58  ;;  %v1854_v58 = vrot.slane %v6579_v41, 2  ;;  %v4396_v41 = vld [vmem:[%s8289_s1 + $0x40] sm:$0xff] }
  0xc3   : > { %5189 = vmatprep.mubr.msk.f32.mxu0 %vm403_vm0, %v6793_v35 }
  0xc4   : > { %v6854_v28 = vsel %vm954_vm2, %v1852_v25, %v1854_v58 }
  0xc5   : > { %5040 = vmatmul.mubr.msk.f32.gmra.mrb[16].mxu1 %vm403_vm0, %v6728_v21 }
  0xc6   : > { %5190 = vmatmul.mubr.msk.f32.gmra.mrb[22].mxu0 %vm403_vm0, %v6806_v59  ;;  %5042 = vmatprep.mubr.msk.f32.mxu1 %vm403_vm0, %v6739_v6 }
  0xc7   : > { %5192 = vmatprep.mubr.msk.f32.mxu0 %vm403_vm0, %v6810_v2 }
  0xc9   : > { %5043 = vmatmul.mubr.msk.f32.gmra.mrb[18].mxu1 %vm403_vm0, %v6743_v60 }
  0xca   : > { %5193 = vmatmul.mubr.msk.f32.gmra.mrb[24].mxu0 %vm403_vm0, %v6824_v37  ;;  %5045 = vmatprep.mubr.msk.f32.mxu1 %vm403_vm0, %v6756_v44 }
  0xcb   : > { %5195 = vmatprep.mubr.msk.f32.mxu0 %vm403_vm0, %v6828_v30 }
  0xcd   : > { %5046 = vmatmul.mubr.msk.f32.gmra.mrb[20].mxu1 %vm403_vm0, %v6760_v23 }
  0xce   : > { %5196 = vmatmul.mubr.msk.f32.gmra.mrb[26].mxu0 %vm403_vm0, %v6839_v16  ;;  %5048 = vmatprep.mubr.msk.f32.mxu1 %vm403_vm0, %v6772_v5 }
  0xcf   : > { %5198 = vmatprep.mubr.msk.f32.mxu0 %vm403_vm0, %v6843_v20 }
  0xd1   : > { %5049 = vmatmul.mubr.msk.f32.gmra.mrb[22].mxu1 %vm403_vm0, %v6777_v51 }
  0xd2   : > { %5199 = vmatmul.mubr.msk.f32.gmra.mrb[28].mxu0 %vm403_vm0, %v6854_v28  ;;  %5051 = vmatprep.mubr.msk.f32.mxu1 %vm403_vm0, %v6789_v40 }
  0xd3   : > { %5203 = vmatprep.mubr.msk.f32.mxu0 %vm403_vm0, %v6119_v8  ;;  %v6935_v8 = vld [vmem:[%s6096_s14 + $0x160] sm:$0xff] }
  0xd5   : > { %5052 = vmatmul.mubr.msk.f32.gmra.mrb[24].mxu1 %vm403_vm0, %v6793_v35 }
  0xd6   : > { %5204 = vmatmul.mubr.msk.f32.vlgmr.msra.gmra.mrb[0].mxu0 %vm403_vm0, %v6122_v9  ;;  %5054 = vmatprep.mubr.msk.f32.mxu1 %vm403_vm0, %v6806_v59  ;;  %v6938_v9 = vld [vmem:[%s6096_s14 + $0x168] sm:$0xff] }
  0xd7   : > { %5249 = vmatpush3.msra.mxu0 %v6631_v4  ;;  %5206 = vmatprep.mubr.msk.f32.mxu0 %vm403_vm0, %v6130_v10  ;;  %v6945_v10 = vld [vmem:[%s6096_s14 + $0x170] sm:$0xff] }
  0xd8   : > { %5295 = vmatprep.subr.mxu0 %v4396_v41 }
  0xd9   : > { %5055 = vmatmul.mubr.msk.f32.gmra.mrb[26].mxu1 %vm403_vm0, %v6810_v2 }
  0xda   : > { %5207 = vmatmul.mubr.msk.f32.gmra.mrb[2].mxu0 %vm403_vm0, %v6133_v11  ;;  %5057 = vmatprep.mubr.msk.f32.mxu1 %vm403_vm0, %v6824_v37  ;;  %v8385_v11 = vld [vmem:[#allocation13_spill] sm:$0xff] }
  0xdb   : > { %5209 = vmatprep.mubr.msk.f32.mxu0 %vm403_vm0, %v6143_v13  ;;  %v8386_v13 = vld [vmem:[#allocation14_spill] sm:$0xff] }
  0xdd   : > { %5058 = vmatmul.mubr.msk.f32.gmra.mrb[28].mxu1 %vm403_vm0, %v6828_v30 }
  0xde   : > { %5210 = vmatmul.mubr.msk.f32.gmra.mrb[4].mxu0 %vm403_vm0, %v6153_v17  ;;  %v8387_v17 = vld [vmem:[#allocation15_spill] sm:$0xff] }
  0xdf   : > { %5212 = vmatprep.mubr.msk.f32.mxu0 %vm403_vm0, %v6170_v26  ;;  %v8388_v26 = vld [vmem:[#allocation17_spill] sm:$0xff] }
  0xe2   : > { %5213 = vmatmul.mubr.msk.f32.gmra.mrb[6].mxu0 %vm403_vm0, %v6176_v29  ;;  %v8389_v29 = vld [vmem:[#allocation19_spill] sm:$0xff] }
  0xe3   : > { %5215 = vmatprep.mubr.msk.f32.mxu0 %vm403_vm0, %v6188_v31  ;;  %v8390_v31 = vld [vmem:[#allocation20_spill] sm:$0xff] }
  0xe6   : > { %5216 = vmatmul.mubr.msk.f32.gmra.mrb[8].mxu0 %vm403_vm0, %v6195_v34  ;;  %v8391_v34 = vld [vmem:[#allocation22_spill] sm:$0xff] }
  0xe7   : > { %5218 = vmatprep.mubr.msk.f32.mxu0 %vm403_vm0, %v6214_v39  ;;  %v8392_v39 = vld [vmem:[#allocation23_spill] sm:$0xff] }
  0xea   : > { %5219 = vmatmul.mubr.msk.f32.gmra.mrb[10].mxu0 %vm403_vm0, %v6221_v42  ;;  %v8393_v42 = vld [vmem:[#allocation24_spill] sm:$0xff] }
  0xeb   : > { %5221 = vmatprep.mubr.msk.f32.mxu0 %vm403_vm0, %v6236_v45  ;;  %v8395_v45 = vld [vmem:[#allocation26_spill] sm:$0xff] }
  0xee   : > { %5222 = vmatmul.mubr.msk.f32.gmra.mrb[12].mxu0 %vm403_vm0, %v6244_v49  ;;  %v8397_v49 = vld [vmem:[#allocation28_spill] sm:$0xff] }
  0xef   : > { %5224 = vmatprep.mubr.msk.f32.mxu0 %vm403_vm0, %v6262_v53  ;;  %v2367_v53 = vrot.slane %v6938_v9, 1 }
  0xf2   : > { %5225 = vmatmul.mubr.msk.f32.gmra.mrb[14].mxu0 %vm403_vm0, %v6269_v56  ;;  %v2369_v56 = vrot.slane %v6945_v10, 1 }
  0xf3   : > { %5227 = vmatprep.mubr.msk.f32.mxu0 %vm403_vm0, %v6288_v61  ;;  %v8399_v61 = vld [vmem:[#allocation30_spill] sm:$0xff] }
  0xf6   : > { %5228 = vmatmul.mubr.msk.f32.gmra.mrb[16].mxu0 %vm403_vm0, %v6295_v0 }
  0xf7   : > { %5230 = vmatprep.mubr.msk.f32.mxu0 %vm403_vm0, %v6310_v3  ;;  %v2370_v3 = vsel %vm330_vm1, %v2367_v53, %v2369_v56 }
  0xfa   : > { %5231 = vmatmul.mubr.msk.f32.gmra.mrb[18].mxu0 %vm403_vm0, %v8367_v52 }
  0xfb   : > { %5233 = vmatprep.mubr.msk.f32.mxu0 %vm403_vm0, %v8368_v32 }
  0xfe   : > { %5234 = vmatmul.mubr.msk.f32.gmra.mrb[20].mxu0 %vm403_vm0, %v6343_v33  ;;  %v8404_v33 = vld [vmem:[#allocation7_spill] sm:$0xff] }
  0xff   : > { %5236 = vmatprep.mubr.msk.f32.mxu0 %vm403_vm0, %v6362_v47  ;;  %v8406_v47 = vld [vmem:[#allocation16_spill] sm:$0xff] }
 0x102   : > { %5237 = vmatmul.mubr.msk.f32.gmra.mrb[22].mxu0 %vm403_vm0, %v6369_v55  ;;  %v2627_v55 = vrot.slane %v6938_v9, 2 }
 0x103   : > { %5239 = vmatprep.mubr.msk.f32.mxu0 %vm403_vm0, %v6389_v19 }
 0x106   : > { %5240 = vmatmul.mubr.msk.f32.gmra.mrb[24].mxu0 %vm403_vm0, %v6402_v24  ;;  %v8402_v24 = vld [vmem:[#allocation9_spill] sm:$0xff] }
 0x107   : > { %5242 = vmatprep.mubr.msk.f32.mxu0 %vm403_vm0, %v6420_v63  ;;  %v2629_v63 = vrot.slane %v6945_v10, 2 }
 0x10a   : > { %5243 = vmatmul.mubr.msk.f32.gmra.mrb[26].mxu0 %vm403_vm0, %v6935_v8 }
 0x10b   : > { %5245 = vmatprep.mubr.msk.f32.mxu0 %vm403_vm0, %v6938_v9 }
 0x10e   : > { %5246 = vmatmul.mubr.msk.f32.gmra.mrb[28].mxu0 %vm403_vm0, %v6945_v10 }
 0x10f   : > { %5250 = vmatprep.mubr.msk.f32.mxu0 %vm403_vm0, %v6224_v43  ;;  %v8394_v43 = vld [vmem:[#allocation25_spill] sm:$0xff] }
 0x112   : > { %5251 = vmatmul.mubr.msk.f32.vlgmr.msra.gmra.mrb[0].mxu0 %vm403_vm0, %v6239_v46  ;;  %v8396_v46 = vld [vmem:[#allocation27_spill] sm:$0xff] }
 0x113   : > { %5296 = vmatpush3.msra.mxu0 %v4396_v41  ;;  %5253 = vmatprep.mubr.msk.f32.mxu0 %vm403_vm0, %v6247_v50  ;;  %v2366_v50 = vrot.slane %v6935_v8, 1 }
 0x115   : > { %v2368_v0 = vsel %vm330_vm1, %v2366_v50, %v2367_v53  ;;  %v3484_v53 = vld [vmem:[%s8291_s3 + $0x80] sm:$0xff] }
 0x116   : > { %5254 = vmatmul.mubr.msk.f32.gmra.mrb[2].mxu0 %vm403_vm0, %v6265_v54  ;;  %v8398_v54 = vld [vmem:[#allocation29_spill] sm:$0xff] }
 0x117   : > { %5256 = vmatprep.mubr.msk.f32.mxu0 %vm403_vm0, %v6272_v57  ;;  %v288_v57 = vld [vmem:[%s6096_s14 + $0x178] sm:$0x3]  ;;  %s4428_s14 = sadd.s32 4294967295, %s4147_s13  ;;  %s5973_s13 = smov 64  }
 0x11a   : > { %5257 = vmatmul.mubr.msk.f32.gmra.mrb[4].mxu0 %vm403_vm0, %v6291_v62  ;;  %v8400_v62 = vld [vmem:[#allocation31_spill] sm:$0xff] }
 0x11b   : > { %5259 = vmatprep.mubr.msk.f32.mxu0 %vm403_vm0, %v6298_v1  ;;  %v2371_v1 = vrot.slane %v288_v57, 1 }
 0x11e   : > { %5260 = vmatmul.mubr.msk.f32.gmra.mrb[6].mxu0 %vm403_vm0, %v6313_v15  ;;  %v2372_v15 = vsel %vm330_vm1, %v2369_v56, %v2371_v1  ;;  %v3468_v56 = vld [vmem:[%s8291_s3] sm:$0xff]  ;;  %v3487_v1 = vld [vmem:[%s8291_s3 + $0x98] sm:$0xff] }
 0x11f   : > { %5262 = vmatprep.mubr.msk.f32.mxu0 %vm403_vm0, %v6321_v22  ;;  %v8401_v22 = vld [vmem:[#allocation6_spill] sm:$0xff] }
 0x122   : > { %5263 = vmatmul.mubr.msk.f32.gmra.mrb[8].mxu0 %vm403_vm0, %v6339_v27  ;;  %v8403_v27 = vld [vmem:[#allocation11_spill] sm:$0xff] }
 0x123   : > { %5265 = vmatprep.mubr.msk.f32.mxu0 %vm403_vm0, %v6346_v36  ;;  %v8405_v36 = vld [vmem:[#allocation5_spill] sm:$0xff] }
 0x126   : > { %5266 = vmatmul.mubr.msk.f32.gmra.mrb[10].mxu0 %vm403_vm0, %v8385_v11 }
 0x127   : > { %5268 = vmatprep.mubr.msk.f32.mxu0 %vm403_vm0, %v8386_v13 }
 0x12a   : > { %5269 = vmatmul.mubr.msk.f32.gmra.mrb[12].mxu0 %vm403_vm0, %v8387_v17 }
 0x12b   : > { %5271 = vmatprep.mubr.msk.f32.mxu0 %vm403_vm0, %v8388_v26 }
 0x12e   : > { %5272 = vmatmul.mubr.msk.f32.gmra.mrb[14].mxu0 %vm403_vm0, %v8389_v29  ;;  %v2964_v29 = vlaneseq }
 0x12f   : > { %5274 = vmatprep.mubr.msk.f32.mxu0 %vm403_vm0, %v8390_v31 }
 0x130   : > { %v2965_v31 = vshrl.u32 %v2964_v29, 7  ;;  %v3493_v29 = vld [vmem:[%s8291_s3 + $0xc8] sm:$0xff] }
 0x132   : > { %5275 = vmatmul.mubr.msk.f32.gmra.mrb[16].mxu0 %vm403_vm0, %v8391_v34  ;;  %v2967_v34 = vadd.s32 16, %v2965_v31 }
 0x133   : > { %5277 = vmatprep.mubr.msk.f32.mxu0 %vm403_vm0, %v8392_v39  ;;  %v7137_v39 = vstv %s4428_s14 }
 0x134   : > { %vm2971_vm10 = vcmp.ge.s32.totalorder %v7137_v39, 0  ;;  %vm2981_vm11 = vcmp.lt.s32.totalorder %v7137_v39, 16 }
 0x135   : > { %vm7271_vm12 = vmand %vm2971_vm10, %vm2981_vm11 }
 0x136   : > { %5278 = vmatmul.mubr.msk.f32.gmra.mrb[18].mxu0 %vm403_vm0, %v8393_v42  ;;  %v7139_v42 = vadd.s32 4294967295, %v2965_v31 }
 0x137   : > { %5280 = vmatprep.mubr.msk.f32.mxu0 %vm403_vm0, %v8394_v43  ;;  %v2963_v43 = vadd.s32 9, %v7137_v39 }
 0x138   : > { %vm3001_vm5 = vcmp.ge.s32.totalorder %v7139_v42, 0 }
 0x139   : > { %vm2980_vm3 = vcmp.ge.s32.totalorder %v2963_v43, 0  ;;  %vm2990_vm4 = vcmp.lt.s32.totalorder %v2963_v43, 16  ;;  %v3476_v43 = vld [vmem:[%s8291_s3 + $0x40] sm:$0xff]  ;;  %vm3004_vm15 = vmand %vm7271_vm12, %vm3001_vm5 }
 0x13a   : > { %5281 = vmatmul.mubr.msk.f32.gmra.mrb[20].mxu0 %vm403_vm0, %v8395_v45  ;;  %v7142_v45 = vadd.s32 4294967295, %v2967_v34  ;;  %vm7145_vm6 = vmand %vm2980_vm3, %vm2990_vm4 }
 0x13b   : > { %5283 = vmatprep.mubr.msk.f32.mxu0 %vm403_vm0, %v8396_v46  ;;  %vm7153_vm7 = vmand %vm7145_vm6, %vm3001_vm5 }
 0x13c   : > { %vm3036_vm8 = vcmp.lt.s32.totalorder %v7142_v45, 16 }
 0x13d   : > { %vm7162_vm9 = vmand %vm7145_vm6, %vm3036_vm8 }
 0x13e   : > { %5284 = vmatmul.mubr.msk.f32.gmra.mrb[22].mxu0 %vm403_vm0, %v8397_v49  ;;  %vm3039_vm4 = vmand %vm7271_vm12, %vm3036_vm8 }
 0x13f   : > { %5286 = vmatprep.mubr.msk.f32.mxu0 %vm403_vm0, %v8398_v54  ;;  %v3485_v54 = vld [vmem:[%s8291_s3 + $0x88] sm:$0xff] }
 0x142   : > { %5287 = vmatmul.mubr.msk.f32.gmra.mrb[24].mxu0 %vm403_vm0, %v8399_v61  ;;  %v3469_v61 = vld [vmem:[%s8291_s3 + $0x8] sm:$0xff] }
 0x143   : > { %5289 = vmatprep.mubr.msk.f32.mxu0 %vm403_vm0, %v8400_v62  ;;  %v5384_v62 = vpack.c.bf16 %v3469_v61, %v3468_v56  ;;  %v3495_v56 = vld [vmem:[%s8291_s3 + $0xd8] sm:$0xff] }
 0x146   : > { %5290 = vmatmul.mubr.msk.f32.gmra.mrb[26].mxu0 %vm403_vm0, %v2368_v0  ;;  %v3486_v0 = vld [vmem:[%s8291_s3 + $0x90] sm:$0xff] }
 0x147   : > { %5292 = vmatprep.mubr.msk.f32.mxu0 %vm403_vm0, %v2370_v3  ;;  %v3470_v3 = vld [vmem:[%s8291_s3 + $0x10] sm:$0xff] }
 0x14a   : > { %5293 = vmatmul.mubr.msk.f32.gmra.mrb[28].mxu0 %vm403_vm0, %v2372_v15  ;;  %v5386_v15 = vpack.c.bf16 %v3487_v1, %v3486_v0  ;;  %v3479_v0 = vld [vmem:[%s8291_s3 + $0x58] sm:$0xff]  ;;  %v3496_v1 = vld [vmem:[%s8291_s3 + $0xe0] sm:$0xff] }
 0x14b   : > { %5297 = vmatprep.mubr.msk.f32.mxu0 %vm403_vm0, %v6637_v7  ;;  %v2631_v7 = vrot.slane %v288_v57, 2  ;;  %v5382_v57 = vpack.c.bf16 %v3485_v54, %v3484_v53  ;;  %v3477_v53 = vld [vmem:[%s8291_s3 + $0x48] sm:$0xff]  ;;  %v3494_v54 = vld [vmem:[%s8291_s3 + $0xd0] sm:$0xff] }
 0x14c   : > { %v5402_v61 = vpack.c.bf16 %v3495_v56, %v3494_v54 }
 0x14d   : > { %5383 = vmatprep.subr.bf16.mxu1 %v5382_v57  ;;  %v5400_v57 = vpack.c.bf16 %v3477_v53, %v3476_v43 }
 0x14e   : > { %5298 = vmatmul.mubr.msk.f32.vlgmr.msra.gmra.mrb[0].mxu0 %vm403_vm0, %v6641_v38  ;;  %v8407_v38 = vld [vmem:[#allocation8_spill] sm:$0xff]  ;;  %5385 = vmatpush3.bf16.msra.mxu1 %v5384_v62  ;;  %v3478_v62 = vld [vmem:[%s8291_s3 + $0x50] sm:$0xff] }
 0x14f   : > { %5300 = vmatprep.mubr.msk.f32.mxu0 %vm403_vm0, %v8401_v22  ;;  %v3471_v22 = vld [vmem:[%s8291_s3 + $0x18] sm:$0xff]  ;;  %5387 = vmatprep.subr.bf16.mxu1 %v5386_v15  ;;  %v5404_v15 = vpack.c.bf16 %v3479_v0, %v3478_v62  ;;  %v3516_v62 = vld [vmem:[%s8291_s3 + $0x180] sm:$0xff]  ;;  %v3517_v0 = vld [vmem:[%s8291_s3 + $0x188] sm:$0xff] }
 0x152   : > { %5301 = vmatmul.mubr.msk.f32.gmra.mrb[2].mxu0 %vm403_vm0, %v8402_v24  ;;  %v5388_v24 = vpack.c.bf16 %v3471_v22, %v3470_v3  ;;  %v3497_v3 = vld [vmem:[%s8291_s3 + $0xe8] sm:$0xff] }
 0x153   : > { %5303 = vmatprep.mubr.msk.f32.mxu0 %vm403_vm0, %v8403_v27  ;;  %v3488_v27 = vld [vmem:[%s8291_s3 + $0xa0] sm:$0xff]  ;;  %v5406_v22 = vpack.c.bf16 %v3497_v3, %v3496_v1 }
 0x154   : > { %5389 = vmatpush3.bf16.msra.mxu1 %v5388_v24  ;;  %v3480_v24 = vld [vmem:[%s8291_s3 + $0x60] sm:$0xff] }
 0x156   : > { %5304 = vmatmul.mubr.msk.f32.gmra.mrb[4].mxu0 %vm403_vm0, %v8404_v33  ;;  %v3489_v33 = vld [vmem:[%s8291_s3 + $0xa8] sm:$0xff] }
 0x157   : > { %5306 = vmatprep.mubr.msk.f32.mxu0 %vm403_vm0, %v8405_v36  ;;  %v3472_v36 = vld [vmem:[%s8291_s3 + $0x20] sm:$0xff] }
 0x15a   : > { %5307 = vmatmul.mubr.msk.f32.gmra.mrb[6].mxu0 %vm403_vm0, %v6698_v48  ;;  %v2626_v48 = vrot.slane %v6935_v8, 2 }
 0x15b   : > { %5309 = vmatprep.mubr.msk.f32.mxu0 %vm403_vm0, %v8406_v47  ;;  %v5390_v47 = vpack.c.bf16 %v3489_v33, %v3488_v27  ;;  %v3481_v27 = vld [vmem:[%s8291_s3 + $0x68] sm:$0xff]  ;;  %v3498_v33 = vld [vmem:[%s8291_s3 + $0xf0] sm:$0xff] }
 0x15c   : > { %v2628_v4 = vsel %vm954_vm2, %v2626_v48, %v2627_v55 }
 0x15d   : > { %5391 = vmatprep.subr.bf16.mxu1 %v5390_v47  ;;  %v5408_v47 = vpack.c.bf16 %v3481_v27, %v3480_v24 }
 0x15e   : > { %5310 = vmatmul.mubr.msk.f32.gmra.mrb[8].mxu0 %vm403_vm0, %v6713_v18  ;;  %v2630_v18 = vsel %vm954_vm2, %v2627_v55, %v2629_v63  ;;  %v3490_v55 = vld [vmem:[%s8291_s3 + $0xb0] sm:$0xff] }
 0x15f   : > { %5312 = vmatprep.mubr.msk.f32.mxu0 %vm403_vm0, %v8407_v38  ;;  %v3473_v38 = vld [vmem:[%s8291_s3 + $0x28] sm:$0xff] }
 0x160   : > { %v5392_v48 = vpack.c.bf16 %v3473_v38, %v3472_v36  ;;  %v3499_v36 = vld [vmem:[%s8291_s3 + $0xf8] sm:$0xff] }
 0x161   : > { %v5410_v38 = vpack.c.bf16 %v3499_v36, %v3498_v33 }
 0x162   : > { %5313 = vmatmul.mubr.msk.f32.gmra.mrb[10].mxu0 %vm403_vm0, %v6728_v21  ;;  %v2632_v21 = vsel %vm954_vm2, %v2629_v63, %v2631_v7  ;;  %5393 = vmatpush3.bf16.msra.mxu1 %v5392_v48  ;;  %v3491_v63 = vld [vmem:[%s8291_s3 + $0xb8] sm:$0xff]  ;;  %v3482_v48 = vld [vmem:[%s8291_s3 + $0x70] sm:$0xff] }
 0x163   : > { %5315 = vmatprep.mubr.msk.f32.mxu0 %vm403_vm0, %v6739_v6  ;;  %v5394_v7 = vpack.c.bf16 %v3491_v63, %v3490_v55  ;;  %v3483_v55 = vld [vmem:[%s8291_s3 + $0x78] sm:$0xff] }
 0x164   : > { %v5412_v63 = vpack.c.bf16 %v3483_v55, %v3482_v48 }
 0x165   : > { %5395 = vmatprep.subr.bf16.mxu1 %v5394_v7 }
 0x166   : > { %5316 = vmatmul.mubr.msk.f32.gmra.mrb[12].mxu0 %vm403_vm0, %v6743_v60 }
 0x167   : > { %5318 = vmatprep.mubr.msk.f32.mxu0 %vm403_vm0, %v6756_v44 }
 0x16a   : > { %5319 = vmatmul.mubr.msk.f32.gmra.mrb[14].mxu0 %vm403_vm0, %v6760_v23 }
 0x16b   : > { %5321 = vmatprep.mubr.msk.f32.mxu0 %vm403_vm0, %v6772_v5 }
 0x16e   : > { %5322 = vmatmul.mubr.msk.f32.gmra.mrb[16].mxu0 %vm403_vm0, %v6777_v51 }
 0x16f   : > { %5324 = vmatprep.mubr.msk.f32.mxu0 %vm403_vm0, %v6789_v40 }
 0x172   : > { %5325 = vmatmul.mubr.msk.f32.gmra.mrb[18].mxu0 %vm403_vm0, %v6793_v35 }
 0x173   : > { %5327 = vmatprep.mubr.msk.f32.mxu0 %vm403_vm0, %v6806_v59 }
 0x176   : > { %5328 = vmatmul.mubr.msk.f32.gmra.mrb[20].mxu0 %vm403_vm0, %v6810_v2 }
 0x177   : > { %5330 = vmatprep.mubr.msk.f32.mxu0 %vm403_vm0, %v6824_v37 }
 0x178   : > { %v7065_v19 = vpop.f32.mrb[0].mxu1 }
 0x179   : > { %v7068_v52 = vpop.f32.mrb[1].mxu1 }
 0x17a   : > { %5331 = vmatmul.mubr.msk.f32.gmra.mrb[22].mxu0 %vm403_vm0, %v6828_v30 }
 0x17b   : > { %5333 = vmatprep.mubr.msk.f32.mxu0 %vm403_vm0, %v6839_v16 }
 0x17c   : > { %v7075_v32 = vpop.f32.mrb[2].mxu1 }
 0x17d   : > { %v7078_v58 = vpop.f32.mrb[3].mxu1 }
 0x17e   : > { %5334 = vmatmul.mubr.msk.f32.gmra.mrb[24].mxu0 %vm403_vm0, %v6843_v20 }
 0x17f   : > { %5336 = vmatprep.mubr.msk.f32.mxu0 %vm403_vm0, %v6854_v28 }
 0x180   : > { %v7083_v6 = vpop.f32.mrb[4].mxu1 }
 0x181   : > { %v7085_v60 = vpop.f32.mrb[5].mxu1 }
 0x182   : > { %5337 = vmatmul.mubr.msk.f32.gmra.mrb[26].mxu0 %vm403_vm0, %v2628_v4  ;;  %v3474_v4 = vld [vmem:[%s8291_s3 + $0x30] sm:$0xff] }
 0x183   : > { %5339 = vmatprep.mubr.msk.f32.mxu0 %vm403_vm0, %v2630_v18  ;;  %v3475_v18 = vld [vmem:[%s8291_s3 + $0x38] sm:$0xff] }
 0x184   : > { %v7088_v44 = vpop.f32.mrb[6].mxu1  ;;  %v5396_v31 = vpack.c.bf16 %v3475_v18, %v3474_v4  ;;  %v2955_v4 = vadd.s32 1, %v7137_v39  ;;  %v7268_v18 = vld [vmem:[%s8290_s2] ss:$0 sm:$0xff] }
 0x185   : > { %v7090_v23 = vpop.f32.mrb[7].mxu1 }
 0x186   : > { %5340 = vmatmul.mubr.msk.f32.gmra.mrb[28].mxu0 %vm403_vm0, %v2632_v21  ;;  %v3492_v21 = vld [vmem:[%s8291_s3 + $0xc0] sm:$0xff]  ;;  %5397 = vmatpush3.bf16.msra.mxu1 %v5396_v31  ;;  %vm2972_vm13 = vcmp.ge.s32.totalorder %v2955_v4, 0  ;;  %vm2982_vm14 = vcmp.lt.s32.totalorder %v2955_v4, 16  ;;  %v2957_v4 = vadd.s32 3, %v7137_v39 }
 0x187   : > { %v5398_v34 = vpack.c.bf16 %v3493_v29, %v3492_v21  ;;  %vm7283_vm0 = vmand %vm2972_vm13, %vm2982_vm14 }
 0x188   : > { %v7092_v5 = vpop.f32.mrb[8].mxu1  ;;  %vm3007_vm3 = vmand %vm7283_vm0, %vm3001_vm5  ;;  %vm2974_vm14 = vcmp.ge.s32.totalorder %v2957_v4, 0 }
 0x189   : > { %v7094_v51 = vpop.f32.mrb[9].mxu1  ;;  %5399 = vmatprep.subr.bf16.mxu1 %v5398_v34 }
 0x18a   : > { %5401 = vmatpush3.bf16.msra.mxu1 %v5400_v57 }
 0x18b   : > { %5403 = vmatprep.subr.bf16.mxu1 %v5402_v61  ;;  %v2956_v61 = vadd.s32 2, %v7137_v39 }
 0x18c   : > { %v7096_v40 = vpop.f32.mrb[10].mxu1 }
 0x18d   : > { %v7098_v35 = vpop.f32.mrb[11].mxu1  ;;  %vm2973_vm10 = vcmp.ge.s32.totalorder %v2956_v61, 0  ;;  %vm2983_vm11 = vcmp.lt.s32.totalorder %v2956_v61, 16  ;;  %v2958_v61 = vadd.s32 4, %v7137_v39 }
 0x18e   : > { %5405 = vmatpush3.bf16.msra.mxu1 %v5404_v15  ;;  %v5414_v15 = vpack.c.bf16 %v3517_v0, %v3516_v62  ;;  %vm7331_vm13 = vmand %vm2973_vm10, %vm2983_vm11 }
 0x18f   : > { %5407 = vmatprep.subr.bf16.mxu1 %v5406_v22  ;;  %vm3045_vm11 = vmand %vm7331_vm13, %vm3036_vm8 }
 0x190   : > { %v7100_v59 = vpop.f32.mrb[12].mxu1 }
 0x191   : > { %v7102_v14 = vpop.f32.mrb[13].mxu1 }
 0x192   : > { %5409 = vmatpush3.bf16.msra.mxu1 %v5408_v47 }
 0x193   : > { %5411 = vmatprep.subr.bf16.mxu1 %v5410_v38 }
 0x194   : > { %v7104_v2 = vpop.f32.mrb[14].mxu1 }
 0x195   : > { %v7106_v12 = vpop.f32.mrb[15].mxu1 }
 0x196   : > { %5413 = vmatpush3.bf16.msra.mxu1 %v5412_v63 }
 0x197   : > { %5415 = vmatprep.subr.bf16.mxu1 %v5414_v15 }
 0x198   : > { %v7108_v37 = vpop.f32.mrb[16].mxu1 }
 0x199   : > { %v7110_v25 = vpop.f32.mrb[17].mxu1 }
 0x19c   : > { %v7112_v30 = vpop.f32.mrb[18].mxu1 }
 0x19d   : > { %v7114_v16 = vpop.f32.mrb[19].mxu1 }
 0x1a0   : > { %v7116_v20 = vpop.f32.mrb[20].mxu1 }
 0x1a1   : > { %v7118_v28 = vpop.f32.mrb[21].mxu1 }
 0x1a4   : > { %v7120_v41 = vpop.f32.mrb[22].mxu1 }
 0x1a5   : > { %v7122_v8 = vpop.f32.mrb[23].mxu1 }
 0x1a8   : > { %v7124_v9 = vpop.f32.mrb[24].mxu1 }
 0x1a9   : > { %v7126_v10 = vpop.f32.mrb[25].mxu1 }
 0x1ac   : > { %v7128_v11 = vpop.f32.mrb[26].mxu1 }
 0x1ad   : > { %v7130_v13 = vpop.f32.mrb[27].mxu1 }
 0x1b0   : > { %v7132_v17 = vpop.f32.mrb[28].mxu1 }
 0x1b1   : > { %v7134_v26 = vpop.f32.mrb[29].mxu1 }
 0x221   : > { %v5299_v7 = vpop.f32.mrb[0].mxu0 }
 0x222   : > { %v5462_v21 = vadd.f32 %v5299_v7, %v7065_v19  ;;  %v2707_v31 = vpop.f32.mrb[1].mxu0 }
 0x223   : > { %v5463_v34 = vadd.f32 %v2707_v31, %v7068_v52 }
 0x224   : > { %v2894_v43 = vadd.f32 %v5462_v21, %v7268_v18 }
 0x225   : > { %v2893_v53 = vadd.f32 %v5463_v34, %v7268_v18  ;;  %v5302_v54 = vpop.f32.mrb[2].mxu0 }
 0x226   : > { %v2924_v19 = vmax.f32 %v2894_v43, 0.0  ;;  %v5464_v56 = vadd.f32 %v5302_v54, %v7075_v32  ;;  %v2717_v52 = vpop.f32.mrb[3].mxu0 }
 0x227   : > { %v2923_v1 = vmax.f32 %v2893_v53, 0.0  ;;  %v5465_v3 = vadd.f32 %v2717_v52, %v7078_v58 }
 0x228   : > { %v7297_v32 = vsel %vm7271_vm12, %v2924_v19, 0.0  ;;  %v2896_v22 = vadd.f32 %v5464_v56, %v7268_v18  ;;  %vm3042_vm12 = vmand %vm7283_vm0, %vm3036_vm8 }
 0x229   : > { %v7300_v24 = vsel %vm3004_vm15, %v2923_v1, 0.0  ;;  %v2895_v27 = vadd.f32 %v5465_v3, %v7268_v18  ;;  %v5305_v33 = vpop.f32.mrb[4].mxu0  ;;  %v3122_v36 = vrot.slane %v7297_v32, 1  ;;  %vm2984_vm15 = vcmp.lt.s32.totalorder %v2957_v4, 16 }
 0x22a   : > { %v2926_v58 = vmax.f32 %v2896_v22, 0.0  ;;  %v5466_v47 = vadd.f32 %v5305_v33, %v7083_v6  ;;  %v2727_v38 = vpop.f32.mrb[5].mxu0  ;;  %v3121_v48 = vrot.slane %v7300_v24, 1 }
 0x22b   : > { %v2925_v55 = vmax.f32 %v2895_v27, 0.0  ;;  %v5467_v63 = vadd.f32 %v2727_v38, %v7085_v60 }
 0x22c   : > { %v7316_v7 = vsel %vm3007_vm3, %v2926_v58, 0.0  ;;  %v2898_v21 = vadd.f32 %v5466_v47, %v7268_v18  ;;  %v3123_v31 = vsel %vm330_vm1, %v3121_v48, %v3122_v36  ;;  %vm7351_vm3 = vmand %vm7331_vm13, %vm3001_vm5 }
 0x22d   : > { %v7320_v29 = vsel %vm3039_vm4, %v2925_v55, 0.0  ;;  %v2897_v6 = vadd.f32 %v5467_v63, %v7268_v18  ;;  %v5308_v34 = vpop.f32.mrb[6].mxu0  ;;  %v5777_v60 = vpack.i.bf16 %v3123_v31, %v7316_v7  ;;  %v3126_v27 = vrot.slane %v7316_v7, 1  ;;  %vm7357_vm4 = vmand %vm2974_vm14, %vm2984_vm15 }
 0x22e   : > { %v3124_v43 = vrot.slane %v7320_v29, 1  ;;  %v2928_v53 = vmax.f32 %v2898_v21, 0.0  ;;  %v5468_v54 = vadd.f32 %v5308_v34, %v7088_v44  ;;  %v2737_v56 = vpop.f32.mrb[7].mxu0  ;;  %vm3013_vm10 = vmand %vm7357_vm4, %vm3001_vm5 }
 0x22f   : > { %v2927_v52 = vmax.f32 %v2897_v6, 0.0  ;;  %v5469_v62 = vadd.f32 %v2737_v56, %v7090_v23  ;;  %5778 = vrot.lane.b32.xlu0 %v5777_v60, %s5973_s13  ;;  %v2959_v60 = vadd.s32 5, %v7137_v39 }
 0x230   : > { %v7337_v0 = vsel %vm3042_vm12, %v2928_v53, 0.0  ;;  %v2900_v1 = vadd.f32 %v5468_v54, %v7268_v18  ;;  %v3125_v44 = vsel %vm330_vm1, %v3122_v36, %v3124_v43  ;;  %vm2985_vm12 = vcmp.lt.s32.totalorder %v2958_v61, 16 }
 0x231   : > { %v7344_v3 = vsel %vm7283_vm0, %v2927_v52, 0.0  ;;  %v2899_v15 = vadd.f32 %v5469_v62, %v7268_v18  ;;  %v5311_v22 = vpop.f32.mrb[8].mxu0  ;;  %v3129_v48 = vrot.slane %v7337_v0, 1  ;;  %vm2975_vm0 = vcmp.ge.s32.totalorder %v2958_v61, 0 }
 0x232   : > { %v2930_v33 = vmax.f32 %v2900_v1, 0.0  ;;  %v5470_v36 = vadd.f32 %v5311_v22, %v7092_v5  ;;  %v2747_v58 = vpop.f32.mrb[9].mxu0  ;;  %v5782_v47 = vpack.i.bf16 %v3125_v44, %v7344_v3  ;;  %v3127_v38 = vrot.slane %v7344_v3, 1  ;;  %vm7421_vm15 = vmand %vm2975_vm0, %vm2985_vm12 }
 0x233   : > { %v2929_v55 = vmax.f32 %v2899_v15, 0.0  ;;  %v5471_v63 = vadd.f32 %v2747_v58, %v7094_v51  ;;  %vm2976_vm14 = vcmp.ge.s32.totalorder %v2959_v60, 0  ;;  %vm7450_vm0 = vmand %vm7421_vm15, %vm3001_vm5 }
 0x234   : > { %v7367_v4 = vsel %vm7331_vm13, %v2930_v33, 0.0  ;;  %v2902_v5 = vadd.f32 %v5470_v36, %v7268_v18  ;;  %5783 = vrot.lane.b32.xlu0 %v5782_v47, %s5973_s13  ;;  %v7372_v21 = vsel %vm330_vm1, %v3126_v27, %v3127_v38  ;;  %v7395_v44 = vsel %vm330_vm1, %v3127_v38, %v3129_v48  ;;  %vm7410_vm13 = vmand %vm7357_vm4, %vm3036_vm8 }
 0x235   : > { %v3132_v31 = vrot.slane %v7367_v4, 1  ;;  %v7377_v6 = vsel %vm7351_vm3, %v2929_v55, 0.0  ;;  %v2901_v51 = vadd.f32 %v5471_v63, %v7268_v18  ;;  %v5314_v34 = vpop.f32.mrb[10].mxu0  ;;  %v5792_v55 = vpack.i.bf16 %v7395_v44, %v7367_v4  ;;  %vm3051_vm12 = vmand %vm7421_vm15, %vm3036_vm8 }
 0x236   : > { %v3131_v43 = vrot.slane %v7377_v6, 1  ;;  %v2932_v53 = vmax.f32 %v2902_v5, 0.0  ;;  %v5472_v54 = vadd.f32 %v5314_v34, %v7096_v40  ;;  %v2757_v56 = vpop.f32.mrb[11].mxu0  ;;  %v5787_v52 = vpack.i.bf16 %v7372_v21, %v7377_v6 }
 0x237   : > { %v2931_v62 = vmax.f32 %v2901_v51, 0.0  ;;  %v5473_v1 = vadd.f32 %v2757_v56, %v7098_v35  ;;  %vm2986_vm3 = vcmp.lt.s32.totalorder %v2959_v60, 16  ;;  %v2960_v51 = vadd.s32 6, %v7137_v39 }
 0x238   : > { %v7397_v15 = vsel %vm3013_vm10, %v2932_v53, 0.0  ;;  %v2904_v23 = vadd.f32 %v5472_v54, %v7268_v18  ;;  %5788 = vrot.lane.b32.xlu1 %v5787_v52, %s5973_s13  ;;  %v7402_v19 = vsel %vm330_vm1, %v3131_v43, %v3132_v31 }
 0x239   : > { %v7404_v40 = vsel %vm3045_vm11, %v2931_v62, 0.0  ;;  %v2903_v22 = vadd.f32 %v5473_v1, %v7268_v18  ;;  %v5317_v27 = vpop.f32.mrb[12].mxu0  ;;  %v5797_v33 = vpack.i.bf16 %v7402_v19, %v7397_v15  ;;  %v3136_v43 = vrot.slane %v7397_v15, 1 }
 0x23a   : > { %v3134_v36 = vrot.slane %v7404_v40, 1  ;;  %v2934_v58 = vmax.f32 %v2904_v23, 0.0  ;;  %v5474_v47 = vadd.f32 %v5317_v27, %v7100_v59  ;;  %v2767_v48 = vpop.f32.mrb[13].mxu0  ;;  %vm2977_vm10 = vcmp.ge.s32.totalorder %v2960_v51, 0 }
 0x23b   : > { %v2933_v63 = vmax.f32 %v2903_v22, 0.0  ;;  %v5475_v5 = vadd.f32 %v2767_v48, %v7102_v14  ;;  %5798 = vrot.lane.b32.xlu0 %v5797_v33, %s5973_s13  ;;  %v3176_v46 = vrot.slane %v7397_v15, 2 }
 0x23c   : > { %v7432_v59 = vsel %vm7410_vm13, %v2934_v58, 0.0  ;;  %v2906_v61 = vadd.f32 %v5474_v47, %v7268_v18  ;;  %5793 = vrot.lane.b32.xlu1 %v5792_v55, %s5973_s13  ;;  %v7437_v34 = vsel %vm330_vm1, %v3132_v31, %v3134_v36  ;;  %vm2987_vm13 = vcmp.lt.s32.totalorder %v2960_v51, 16 }
 0x23d   : > { %v3139_v14 = vrot.slane %v7432_v59, 1  ;;  %v7443_v53 = vsel %vm7357_vm4, %v2933_v63, 0.0  ;;  %v2905_v54 = vadd.f32 %v5475_v5, %v7268_v18  ;;  %v5320_v31 = vpop.f32.mrb[14].mxu0  ;;  %vm7458_vm4 = vmand %vm2976_vm14, %vm2986_vm3 }
 0x23e   : > { %v3137_v52 = vrot.slane %v7443_v53, 1  ;;  %v2936_v62 = vmax.f32 %v2906_v61, 0.0  ;;  %v5476_v1 = vadd.f32 %v5320_v31, %v7104_v2  ;;  %v2777_v23 = vpop.f32.mrb[15].mxu0  ;;  %v5802_v35 = vpack.i.bf16 %v7437_v34, %v7443_v53  ;;  %vm3019_vm11 = vmand %vm7458_vm4, %vm3001_vm5 }
 0x23f   : > { %v2935_v22 = vmax.f32 %v2905_v54, 0.0  ;;  %v5477_v27 = vadd.f32 %v2777_v23, %v7106_v12  ;;  %v2961_v31 = vadd.s32 7, %v7137_v39  ;;  %vm3054_vm14 = vmand %vm7458_vm4, %vm3036_vm8  ;;  %v3177_v50 = vrot.slane %v7443_v53, 2 }
 0x240   : > { %v7467_v33 = vsel %vm7421_vm15, %v2936_v62, 0.0  ;;  %v2908_v2 = vadd.f32 %v5476_v1, %v7268_v18  ;;  %5803 = vrot.lane.b32.xlu1 %v5802_v35, %s5973_s13  ;;  %v7472_v60 = vsel %vm330_vm1, %v3137_v52, %v3139_v14  ;;  %v7475_v36 = vsel %vm330_vm1, %v3136_v43, %v3137_v52  ;;  %vm7520_vm15 = vmand %vm2977_vm10, %vm2987_vm13 }
 0x241   : > { %v3142_v58 = vrot.slane %v7467_v33, 1  ;;  %v7480_v12 = vsel %vm7450_vm0, %v2935_v22, 0.0  ;;  %v2907_v47 = vadd.f32 %v5477_v27, %v7268_v18  ;;  %v5323_v48 = vpop.f32.mrb[16].mxu0  ;;  %v5812_v55 = vpack.i.bf16 %v7472_v60, %v7467_v33  ;;  %vm7543_vm10 = vmand %vm7520_vm15, %vm3001_vm5 }
 0x242   : > { %v3141_v63 = vrot.slane %v7480_v12, 1  ;;  %v2938_v5 = vmax.f32 %v2908_v2, 0.0  ;;  %v5478_v61 = vadd.f32 %v5323_v48, %v7108_v37  ;;  %v2787_v43 = vpop.f32.mrb[17].mxu0  ;;  %v5807_v14 = vpack.i.bf16 %v7475_v36, %v7480_v12 }
 0x243   : > { %v2937_v54 = vmax.f32 %v2907_v47, 0.0  ;;  %v5479_v56 = vadd.f32 %v2787_v43, %v7110_v25  ;;  %vm2978_vm3 = vcmp.ge.s32.totalorder %v2961_v31, 0  ;;  %vm2988_vm0 = vcmp.lt.s32.totalorder %v2961_v31, 16 }
 0x244   : > { %v7499_v52 = vsel %vm3019_vm11, %v2938_v5, 0.0  ;;  %v2910_v62 = vadd.f32 %v5478_v61, %v7268_v18  ;;  %5813 = vrot.lane.b32.xlu1 %v5812_v55, %s5973_s13  ;;  %5808 = vrot.lane.b32.xlu0 %v5807_v14, %s5973_s13  ;;  %v7505_v37 = vsel %vm330_vm1, %v3141_v63, %v3142_v58  ;;  %vm7550_vm11 = vmand %vm2978_vm3, %vm2988_vm0 }
 0x245   : > { %v7507_v38 = vsel %vm3051_vm12, %v2937_v54, 0.0  ;;  %v2909_v25 = vadd.f32 %v5479_v56, %v7268_v18  ;;  %v5326_v1 = vpop.f32.mrb[18].mxu0  ;;  %v5817_v23 = vpack.i.bf16 %v7505_v37, %v7499_v52  ;;  %v3146_v51 = vrot.slane %v7499_v52, 1  ;;  %vm3057_vm12 = vmand %vm7520_vm15, %vm3036_vm8 }
 0x246   : > { %v3144_v35 = vrot.slane %v7507_v38, 1  ;;  %v2940_v22 = vmax.f32 %v2910_v62, 0.0  ;;  %v5480_v27 = vadd.f32 %v5326_v1, %v7112_v30  ;;  %v2797_v47 = vpop.f32.mrb[19].mxu0 }
 0x247   : > { %v2939_v48 = vmax.f32 %v2909_v25, 0.0  ;;  %v5481_v55 = vadd.f32 %v2797_v47, %v7114_v16 }
 0x248   : > { %v7525_v63 = vsel %vm3054_vm14, %v2940_v22, 0.0  ;;  %v2912_v5 = vadd.f32 %v5480_v27, %v7268_v18  ;;  %5818 = vrot.lane.b32.xlu0 %v5817_v23, %s5973_s13  ;;  %v7530_v30 = vsel %vm330_vm1, %v3142_v58, %v3144_v35  ;;  %v2962_v22 = vadd.s32 8, %v7137_v39 }
 0x249   : > { %v3149_v61 = vrot.slane %v7525_v63, 1  ;;  %v7536_v43 = vsel %vm7458_vm4, %v2939_v48, 0.0  ;;  %v2911_v16 = vadd.f32 %v5481_v55, %v7268_v18  ;;  %v5329_v58 = vpop.f32.mrb[20].mxu0  ;;  %vm3025_vm4 = vmand %vm7550_vm11, %vm3001_vm5 }
 0x24a   : > { %v3147_v54 = vrot.slane %v7536_v43, 1  ;;  %v2942_v56 = vmax.f32 %v2912_v5, 0.0  ;;  %v5482_v62 = vadd.f32 %v5329_v58, %v7116_v20  ;;  %v2807_v25 = vpop.f32.mrb[21].mxu0  ;;  %v5822_v1 = vpack.i.bf16 %v7530_v30, %v7536_v43 }
 0x24b   : > { %v2941_v23 = vmax.f32 %v2911_v16, 0.0  ;;  %v5483_v35 = vadd.f32 %v2807_v25, %v7118_v28  ;;  %vm2979_vm13 = vcmp.ge.s32.totalorder %v2962_v22, 0  ;;  %vm2989_vm14 = vcmp.lt.s32.totalorder %v2962_v22, 16 }
 0x24c   : > { %v7560_v27 = vsel %vm7520_vm15, %v2942_v56, 0.0  ;;  %v2914_v20 = vadd.f32 %v5482_v62, %v7268_v18  ;;  %5823 = vrot.lane.b32.xlu1 %v5822_v1, %s5973_s13  ;;  %v7565_v31 = vsel %vm330_vm1, %v3147_v54, %v3149_v61  ;;  %v7568_v47 = vsel %vm330_vm1, %v3146_v51, %v3147_v54  ;;  %vm3060_vm15 = vmand %vm7550_vm11, %vm3036_vm8 }
 0x24d   : > { %v3152_v48 = vrot.slane %v7560_v27, 1  ;;  %v7573_v28 = vsel %vm7543_vm10, %v2941_v23, 0.0  ;;  %v2913_v39 = vadd.f32 %v5483_v35, %v7268_v18  ;;  %v5332_v55 = vpop.f32.mrb[22].mxu0  ;;  %v5832_v5 = vpack.i.bf16 %v7565_v31, %v7560_v27  ;;  %vm7609_vm3 = vmand %vm2979_vm13, %vm2989_vm14 }
 0x24e   : > { %v3151_v51 = vrot.slane %v7573_v28, 1  ;;  %v2944_v61 = vmax.f32 %v2914_v20, 0.0  ;;  %v5484_v16 = vadd.f32 %v5332_v55, %v7120_v41  ;;  %v2817_v14 = vpop.f32.mrb[23].mxu0  ;;  %v5827_v58 = vpack.i.bf16 %v7568_v47, %v7573_v28  ;;  %vm3028_vm0 = vmand %vm7609_vm3, %vm3001_vm5 }
 0x24f   : > { %v2943_v54 = vmax.f32 %v2913_v39, 0.0  ;;  %v5485_v56 = vadd.f32 %v2817_v14, %v7122_v8  ;;  %vm3063_vm5 = vmand %vm7609_vm3, %vm3036_vm8 }
 0x250   : > { %v7591_v62 = vsel %vm3025_vm4, %v2944_v61, 0.0  ;;  %v2916_v25 = vadd.f32 %v5484_v16, %v7268_v18  ;;  %5833 = vrot.lane.b32.xlu1 %v5832_v5, %s5973_s13  ;;  %5828 = vrot.lane.b32.xlu0 %v5827_v58, %s5973_s13  ;;  %v7597_v2 = vsel %vm330_vm1, %v3151_v51, %v3152_v48 }
 0x251   : > { %v7599_v41 = vsel %vm3057_vm12, %v2943_v54, 0.0  ;;  %v2915_v8 = vadd.f32 %v5485_v56, %v7268_v18  ;;  %v5335_v1 = vpop.f32.mrb[24].mxu0  ;;  %v5837_v61 = vpack.i.bf16 %v7597_v2, %v7591_v62  ;;  %v3156_v56 = vrot.slane %v7591_v62, 1 }
 0x252   : > { %v3154_v23 = vrot.slane %v7599_v41, 1  ;;  %v2946_v35 = vmax.f32 %v2916_v25, 0.0  ;;  %v5486_v20 = vadd.f32 %v5335_v1, %v7124_v9  ;;  %v2827_v39 = vpop.f32.mrb[25].mxu0 }
 0x253   : > { %v2945_v55 = vmax.f32 %v2915_v8, 0.0  ;;  %v5487_v51 = vadd.f32 %v2827_v39, %v7126_v10 }
 0x254   : > { %v7616_v16 = vsel %vm3060_vm15, %v2946_v35, 0.0  ;;  %v2918_v14 = vadd.f32 %v5486_v20, %v7268_v18  ;;  %v7620_v58 = vsel %vm330_vm1, %v3152_v48, %v3154_v23  ;;  %5838 = vrot.lane.b32.xlu0 %v5837_v61, %s5973_s13  ;;  %v3169_v61 = vrot.slane %v7337_v0, 2 }
 0x255   : > { %v3159_v9 = vrot.slane %v7616_v16, 1  ;;  %v7625_v22 = vsel %vm7550_vm11, %v2945_v55, 0.0  ;;  %v2917_v54 = vadd.f32 %v5487_v51, %v7268_v18  ;;  %v5338_v10 = vpop.f32.mrb[26].mxu0 }
 0x256   : > { %v3157_v25 = vrot.slane %v7625_v22, 1  ;;  %v2948_v8 = vmax.f32 %v2918_v14, 0.0  ;;  %v5488_v48 = vadd.f32 %v5338_v10, %v7128_v11  ;;  %v2837_v57 = vpop.f32.mrb[27].mxu0  ;;  %v5842_v35 = vpack.i.bf16 %v7620_v58, %v7625_v22 }
 0x257   : > { %v2947_v1 = vmax.f32 %v2917_v54, 0.0  ;;  %v5489_v23 = vadd.f32 %v2837_v57, %v7130_v13  ;;  %v3167_v10 = vrot.slane %v7344_v3, 2 }
 0x258   : > { %v7641_v20 = vsel %vm7609_vm3, %v2948_v8, 0.0  ;;  %v2920_v39 = vadd.f32 %v5488_v48, %v7268_v18  ;;  %v7645_v42 = vsel %vm330_vm1, %v3157_v25, %v3159_v9  ;;  %v7648_v55 = vsel %vm330_vm1, %v3156_v56, %v3157_v25  ;;  %5843 = vrot.lane.b32.xlu1 %v5842_v35, %s5973_s13 }
 0x259   : > { %v7650_v11 = vsel %vm3028_vm0, %v2947_v1, 0.0  ;;  %v2919_v51 = vadd.f32 %v5489_v23, %v7268_v18  ;;  %v5341_v13 = vpop.f32.mrb[28].mxu0  ;;  %v5852_v8 = vpack.i.bf16 %v7645_v42, %v7641_v20  ;;  %v7678_v23 = vsel %vm954_vm2, %v3167_v10, %v3169_v61 }
 0x25a   : > { %v2950_v14 = vmax.f32 %v2920_v39, 0.0  ;;  %v5490_v9 = vadd.f32 %v5341_v13, %v7132_v17  ;;  %v2847_v54 = vpop.f32.mrb[29].mxu0  ;;  %v5847_v0 = vpack.i.bf16 %v7648_v55, %v7650_v11  ;;  %v3174_v35 = vrot.slane %v7404_v40, 2 }
 0x25b   : > { %v2949_v56 = vmax.f32 %v2919_v51, 0.0  ;;  %v5491_v25 = vadd.f32 %v2847_v54, %v7134_v26  ;;  %v3166_v26 = vrot.slane %v7316_v7, 2  ;;  %v3171_v51 = vrot.slane %v7377_v6, 2 }
 0x25c   : > { %v7668_v45 = vsel %vm7153_vm7, %v2950_v14, 0.0  ;;  %v2922_v5 = vadd.f32 %v5490_v9, %v7268_v18  ;;  %5853 = vrot.lane.b32.xlu1 %v5852_v8, %s5973_s13  ;;  %5848 = vrot.lane.b32.xlu0 %v5847_v0, %s5973_s13  ;;  %v3179_v40 = vrot.slane %v7432_v59, 2  ;;  %v3184_v59 = vrot.slane %v7507_v38, 2 }
 0x25d   : > { %v7671_v48 = vsel %vm3063_vm5, %v2949_v56, 0.0  ;;  %v2921_v17 = vadd.f32 %v5491_v25, %v7268_v18  ;;  %v7681_v49 = vsel %vm954_vm2, %v3166_v26, %v3167_v10  ;;  %v3172_v18 = vrot.slane %v7367_v4, 2 }
 0x25e   : > { %v2952_v57 = vmax.f32 %v2922_v5, 0.0  ;;  %v7712_v9 = vsel %vm954_vm2, %v3177_v50, %v3179_v40  ;;  %v7716_v54 = vsel %vm954_vm2, %v3176_v46, %v3177_v50  ;;  %v3182_v10 = vrot.slane %v7467_v33, 2 }
 0x25f   : > { %v2951_v1 = vmax.f32 %v2921_v17, 0.0  ;;  %v7701_v61 = vsel %vm954_vm2, %v3172_v18, %v3174_v35  ;;  %v7704_v14 = vsel %vm954_vm2, %v3171_v51, %v3172_v18  ;;  %v3181_v56 = vrot.slane %v7480_v12, 2 }
 0x260   : > { %v7686_v39 = vsel %vm7162_vm9, %v2952_v57, 0.0  ;;  %3357 = vrot.lane.b32.xlu1 %v7678_v23, %s5973_s13  ;;  %3355 = vrot.lane.b32.xlu0 %v7681_v49, %s5973_s13  ;;  %v3189_v25 = vrot.slane %v7525_v63, 2  ;;  %v3187_v8 = vrot.slane %v7536_v43, 2  ;;  %v7727_v0 = vsel %vm954_vm2, %v3182_v10, %v3184_v59 }
 0x261   : > { %8440 = vst [vmem:[#allocation10_spill] sm:$0xff] %v7686_v39  ;;  %v7692_v13 = vsel %vm7145_vm6, %v2951_v1, 0.0  ;;  %v7730_v38 = vsel %vm954_vm2, %v3181_v56, %v3182_v10  ;;  %v3186_v5 = vrot.slane %v7499_v52, 2  ;;  %v3194_v17 = vrot.slane %v7599_v41, 2 }
 0x262   : > { %8441 = vst [vmem:[#allocation12_spill] sm:$0xff] %v7692_v13  ;;  %v7739_v63 = vsel %vm954_vm2, %v3187_v8, %v3189_v25  ;;  %v3192_v26 = vrot.slane %v7560_v27, 2  ;;  %v3191_v57 = vrot.slane %v7573_v28, 2  ;;  %v3221_v1 = vrot.slane %v7641_v20, 1 }
 0x263   : > { %v3220_v35 = vrot.slane %v7650_v11, 1  ;;  %v3223_v18 = vrot.slane %v7671_v48, 1  ;;  %v7747_v51 = vsel %vm954_vm2, %v3186_v5, %v3187_v8  ;;  %v3199_v41 = vrot.slane %v7616_v16, 2 }
 0x264   : > { %3361 = vrot.lane.b32.xlu1 %v7701_v61, %s5973_s13  ;;  %3359 = vrot.lane.b32.xlu0 %v7704_v14, %s5973_s13  ;;  %v3197_v40 = vrot.slane %v7625_v22, 2  ;;  %v3196_v50 = vrot.slane %v7591_v62, 2  ;;  %v7757_v46 = vsel %vm954_vm2, %v3192_v26, %v3194_v17  ;;  %v7760_v59 = vsel %vm954_vm2, %v3191_v57, %v3192_v26 }
 0x265   : > { %v3252_v10 = vrot.slane %v7686_v39, 1  ;;  %v3250_v56 = vrot.slane %v7692_v13, 1  ;;  %v7765_v25 = vsel %vm330_vm1, %v3220_v35, %v3221_v1  ;;  %v7768_v8 = vsel %vm330_vm1, %v3221_v1, %v3223_v18 }
 0x266   : > { %8442 = vst [vmem:[#allocation18_spill] sm:$0xff] %v7765_v25  ;;  %8443 = vst [vmem:[#allocation21_spill] sm:$0xff] %v7768_v8  ;;  %v3242_v16 = vrot.slane %v7641_v20, 2  ;;  %v3241_v5 = vrot.slane %v7650_v11, 2  ;;  %v3249_v17 = vrot.slane %v7668_v45, 1  ;;  %v3244_v26 = vrot.slane %v7671_v48, 2 }
 0x267   : > { %v7779_v57 = vsel %vm954_vm2, %v3196_v50, %v3197_v40  ;;  %v7782_v1 = vsel %vm954_vm2, %v3197_v40, %v3199_v41  ;;  %v3253_v39 = vsel %vm330_vm1, %v3250_v56, %v3252_v10  ;;  %v3162_v10 = vrot.slane %v7297_v32, 2 }
 0x268   : > { %3365 = vrot.lane.b32.xlu1 %v7712_v9, %s5973_s13  ;;  %3363 = vrot.lane.b32.xlu0 %v7716_v54, %s5973_s13  ;;  %v5857_v35 = vpack.i.bf16 %v7779_v57, %v7765_v25  ;;  %v5862_v18 = vpack.i.bf16 %v7782_v1, %v7768_v8  ;;  %v3251_v13 = vsel %vm330_vm1, %v3249_v17, %v3250_v56  ;;  %v3161_v56 = vrot.slane %v7300_v24, 2  ;;  %v3500_v17 = vld [vmem:[%s8291_s3 + $0x100] sm:$0xff]  ;;  %v3502_v25 = vld [vmem:[%s8291_s3 + $0x110] sm:$0xff] }
 0x269   : > { %v7793_v48 = vsel %vm954_vm2, %v3242_v16, %v3244_v26  ;;  %v7796_v41 = vsel %vm954_vm2, %v3241_v5, %v3242_v16  ;;  %v3501_v16 = vld [vmem:[%s8291_s3 + $0x108] sm:$0xff]  ;;  %vm3415_vm1 = vcmask 523264  }
 0x26a   : > { %8444 = vst [vmem:[#allocation13_spill] sm:$0xff] %v7793_v48  ;;  %8445 = vst [vmem:[#allocation14_spill] sm:$0xff] %v7796_v41  ;;  %v5872_v40 = vpack.i.bf16 %v7793_v48, %v3253_v39  ;;  %v5867_v50 = vpack.i.bf16 %v7796_v41, %v3251_v13  ;;  %v3518_v39 = vld [vmem:[%s8291_s3 + $0x190] sm:$0xff]  ;;  %v3519_v13 = vld [vmem:[%s8291_s3 + $0x198] sm:$0xff] }
 0x26b   : > { %v5418_v8 = vpack.c.bf16 %v3519_v13, %v3518_v39 }
 0x26c   : > { %3369 = vrot.lane.b32.xlu1 %v7727_v0, %s5973_s13  ;;  %3367 = vrot.lane.b32.xlu0 %v7730_v38, %s5973_s13 }
 0x270   : > { %3373 = vrot.lane.b32.xlu1 %v7739_v63, %s5973_s13  ;;  %3371 = vrot.lane.b32.xlu0 %v7747_v51, %s5973_s13 }
 0x274   : > { %3377 = vrot.lane.b32.xlu1 %v7757_v46, %s5973_s13  ;;  %3375 = vrot.lane.b32.xlu0 %v7760_v59, %s5973_s13 }
 0x278   : > { %5858 = vrot.lane.b32.xlu0 %v5857_v35, %s5973_s13  ;;  %5863 = vrot.lane.b32.xlu1 %v5862_v18, %s5973_s13  ;;  %v3163_v18 = vsel %vm954_vm2, %v3161_v56, %v3162_v10 }
 0x27c   : > { %5873 = vrot.lane.b32.xlu1 %v5872_v40, %s5973_s13  ;;  %5868 = vrot.lane.b32.xlu0 %v5867_v50, %s5973_s13  ;;  %v5416_v40 = vpack.c.bf16 %v3501_v16, %v3500_v17  ;;  %v3164_v50 = vrot.slane %v7320_v29, 2  ;;  %v3520_v29 = vld [vmem:[%s8291_s3 + $0x1a0] sm:$0xff]  ;;  %s4059_s13 = sadd.s32 %s4451_s12, %s4450_s10  ;;  %s5883_s10 = scalar_lea.vmem %s5882_s8, 4096 }
 0x27d   : > { %s4452_s21 = sshll.u32 %s4059_s13, 7  ;;  %p5885_p4 = scmp.lt.s32.totalorder %s5883_s10, %s5877_s26 }
 0x27e   : > { %v3165_v16 = vsel %vm954_vm2, %v3162_v10, %v3164_v50  ;;  %s8228_s16 = scalar_lea.hbm %s8293_s5, %s4452_s21 }
 0x27f   : > { %p5886_p5 = por %p5885_p4, %p5884_p2 }
 0x281   : > { %p5887_p6 = pnand %p5886_p5, %p5880_p1 }
 0x2a1   : > { %v5779_v5 = vpop.permute.xlu0 %5778 }
 0x2a2   : > { %v5781_v26 = vunpack.i.h.bf16 %v5779_v5  ;;  %v5780_v35 = vunpack.i.l.bf16 %v5779_v5  ;;  %v3503_v5 = vld [vmem:[%s8291_s3 + $0x118] sm:$0xff] }
 0x2a3   : > { %v5420_v39 = vpack.c.bf16 %v3503_v5, %v3502_v25  ;;  %v3522_v25 = vld [vmem:[%s8291_s3 + $0x1b0] sm:$0xff] }
 0x2a4   : > { %v3432_v48 = vsel %vm3415_vm1, %v3163_v18, %v5780_v35  ;;  %v3416_v41 = vsel %vm3415_vm1, %v7300_v24, %v5781_v26  ;;  %v3521_v24 = vld [vmem:[%s8291_s3 + $0x1a8] sm:$0xff]  ;;  %v3504_v35 = vld [vmem:[%s8291_s3 + $0x120] sm:$0xff] }
 0x2a5   : > { %3643 = vmatprep.mubr.f32.mxu1 %v3432_v48  ;;  %v5422_v26 = vpack.c.bf16 %v3521_v24, %v3520_v29  ;;  %v3505_v18 = vld [vmem:[%s8291_s3 + $0x128] sm:$0xff] }
 0x2a6   : > { %3644 = vmatmul.mubr.f32.vlgmr.msra.gmra.mrb[30].mxu1 %v3416_v41  ;;  %v5784_v56 = vpop.permute.xlu0 %5783  ;;  %v5424_v50 = vpack.c.bf16 %v3505_v18, %v3504_v35 }
 0x2a7   : > { %v5786_v17 = vunpack.i.h.bf16 %v5784_v56  ;;  %v5785_v48 = vunpack.i.l.bf16 %v5784_v56  ;;  %5417 = vmatpush3.bf16.msra.mxu1 %v5416_v40 }
 0x2a8   : > { %5419 = vmatprep.subr.bf16.mxu1 %v5418_v8  ;;  %v3523_v8 = vld [vmem:[%s8291_s3 + $0x1b8] sm:$0xff] }
 0x2a9   : > { %v3433_v13 = vsel %vm3415_vm1, %v3165_v16, %v5785_v48  ;;  %v3417_v41 = vsel %vm3415_vm1, %v7297_v32, %v5786_v17  ;;  %v5426_v24 = vpack.c.bf16 %v3523_v8, %v3522_v25  ;;  %v3506_v17 = vld [vmem:[%s8291_s3 + $0x130] sm:$0xff]  ;;  %v3507_v48 = vld [vmem:[%s8291_s3 + $0x138] sm:$0xff]  ;;  %v3508_v25 = vld [vmem:[%s8291_s3 + $0x140] sm:$0xff] }
 0x2aa   : > { %3648 = vmatprep.mubr.f32.mxu1 %v3433_v13  ;;  %v5789_v40 = vpop.permute.xlu1 %5788  ;;  %v3509_v8 = vld [vmem:[%s8291_s3 + $0x148] sm:$0xff] }
 0x2ab   : > { %v5791_v32 = vunpack.i.h.bf16 %v5789_v40  ;;  %v5790_v10 = vunpack.i.l.bf16 %v5789_v40  ;;  %3649 = vmatmul.mubr.f32.gmra.mrb[32].mxu1 %v3417_v41 }
 0x2ac   : > { %5421 = vmatpush3.bf16.msra.mxu1 %v5420_v39  ;;  %v3524_v39 = vld [vmem:[%s8291_s3 + $0x1c0] sm:$0xff] }
 0x2ad   : > { %v5799_v5 = vpop.permute.xlu0 %5798  ;;  %v3434_v56 = vsel %vm3415_vm1, %v7681_v49, %v5790_v10  ;;  %v3418_v29 = vsel %vm3415_vm1, %v7316_v7, %v5791_v32  ;;  %5423 = vmatprep.subr.bf16.mxu1 %v5422_v26  ;;  %v3525_v7 = vld [vmem:[%s8291_s3 + $0x1c8] sm:$0xff]  ;;  %v5428_v26 = vpack.c.bf16 %v3507_v48, %v3506_v17  ;;  %v3511_v17 = vld [vmem:[%s8291_s3 + $0x158] sm:$0xff] }
 0x2ae   : > { %v5794_v16 = vpop.permute.xlu1 %5793  ;;  %3653 = vmatprep.mubr.f32.mxu1 %v3434_v56  ;;  %v5800_v49 = vunpack.i.l.bf16 %v5799_v5  ;;  %v5430_v40 = vpack.c.bf16 %v3525_v7, %v3524_v39  ;;  %v5801_v32 = vunpack.i.h.bf16 %v5799_v5  ;;  %v3528_v7 = vld [vmem:[%s8291_s3 + $0x1e0] sm:$0xff] }
 0x2af   : > { %v5796_v13 = vunpack.i.h.bf16 %v5794_v16  ;;  %v5795_v41 = vunpack.i.l.bf16 %v5794_v16  ;;  %3654 = vmatmul.mubr.f32.gmra.mrb[34].mxu1 %v3418_v29  ;;  %v5432_v29 = vpack.c.bf16 %v3509_v8, %v3508_v25 }
 0x2b0   : > { %5425 = vmatpush3.bf16.msra.mxu1 %v5424_v50  ;;  %v3436_v56 = vsel %vm3415_vm1, %v7704_v14, %v5800_v49  ;;  %v7891_v39 = vsel %vm3415_vm1, %v7377_v6, %v5801_v32  ;;  %v3529_v49 = vld [vmem:[%s8291_s3 + $0x1e8] sm:$0xff]  ;;  %v3530_v32 = vld [vmem:[%s8291_s3 + $0x1f0] sm:$0xff] }
 0x2b1   : > { %v3435_v35 = vsel %vm3415_vm1, %v7678_v23, %v5795_v41  ;;  %v3419_v18 = vsel %vm3415_vm1, %v7344_v3, %v5796_v13  ;;  %5427 = vmatprep.subr.bf16.mxu1 %v5426_v24  ;;  %v3526_v23 = vld [vmem:[%s8291_s3 + $0x1d0] sm:$0xff]  ;;  %v3527_v3 = vld [vmem:[%s8291_s3 + $0x1d8] sm:$0xff]  ;;  %v5438_v6 = vpack.c.bf16 %v3529_v49, %v3528_v7 }
 0x2b2   : > { %3658 = vmatprep.mubr.f32.mxu1 %v3435_v35  ;;  %v5804_v10 = vpop.permute.xlu1 %5803  ;;  %v5434_v5 = vpack.c.bf16 %v3527_v3, %v3526_v23  ;;  %v3510_v24 = vld [vmem:[%s8291_s3 + $0x150] sm:$0xff] }
 0x2b3   : > { %v5805_v50 = vunpack.i.l.bf16 %v5804_v10  ;;  %3659 = vmatmul.mubr.f32.gmra.mrb[36].mxu1 %v3419_v18  ;;  %v5806_v48 = vunpack.i.h.bf16 %v5804_v10  ;;  %v5436_v35 = vpack.c.bf16 %v3511_v17, %v3510_v24  ;;  %v3512_v18 = vld [vmem:[%s8291_s3 + $0x160] sm:$0xff]  ;;  %v3531_v10 = vld [vmem:[%s8291_s3 + $0x1f8] sm:$0xff] }
 0x2b4   : > { %3663 = vmatprep.mubr.f32.mxu1 %v3436_v56  ;;  %5429 = vmatpush3.bf16.msra.mxu1 %v5428_v26 }
 0x2b5   : > { %5431 = vmatprep.subr.bf16.mxu1 %v5430_v40  ;;  %v3437_v41 = vsel %vm3415_vm1, %v7701_v61, %v5805_v50  ;;  %v3513_v40 = vld [vmem:[%s8291_s3 + $0x168] sm:$0xff]  ;;  %v7910_v8 = vsel %vm3415_vm1, %v7367_v4, %v5806_v48  ;;  %v5442_v4 = vpack.c.bf16 %v3531_v10, %v3530_v32  ;;  %v3532_v48 = vld [vmem:[%s8291_s3 + $0x200] sm:$0xff] }
 0x2b6   : > { %v5809_v16 = vpop.permute.xlu0 %5808  ;;  %v5814_v26 = vpop.permute.xlu1 %5813  ;;  %v5440_v56 = vpack.c.bf16 %v3513_v40, %v3512_v18 }
 0x2b7   : > { %v5810_v13 = vunpack.i.l.bf16 %v5809_v16  ;;  %3664 = vmatmul.mubr.f32.gmra.mrb[38].mxu1 %v7891_v39  ;;  %v5811_v25 = vunpack.i.h.bf16 %v5809_v16  ;;  %v5815_v23 = vunpack.i.l.bf16 %v5814_v26  ;;  %v5816_v24 = vunpack.i.h.bf16 %v5814_v26  ;;  %v3533_v16 = vld [vmem:[%s8291_s3 + $0x208] sm:$0xff] }
 0x2b8   : > { %3668 = vmatprep.mubr.f32.mxu1 %v3437_v41  ;;  %5433 = vmatpush3.bf16.msra.mxu1 %v5432_v29  ;;  %v3514_v29 = vld [vmem:[%s8291_s3 + $0x170] sm:$0xff] }
 0x2b9   : > { %5435 = vmatprep.subr.bf16.mxu1 %v5434_v5  ;;  %v3438_v3 = vsel %vm3415_vm1, %v7716_v54, %v5810_v13  ;;  %v3515_v5 = vld [vmem:[%s8291_s3 + $0x178] sm:$0xff]  ;;  %v7929_v17 = vsel %vm3415_vm1, %v7397_v15, %v5811_v25  ;;  %v3439_v49 = vsel %vm3415_vm1, %v7712_v9, %v5815_v23  ;;  %v7940_v15 = vpack.c.bf16 %v3533_v16, %v3532_v48 }
 0x2ba   : > { %v5819_v50 = vpop.permute.xlu0 %5818  ;;  %v5444_v41 = vpack.c.bf16 %v3515_v5, %v3514_v29 }
 0x2bb   : > { %3669 = vmatmul.mubr.f32.gmra.mrb[40].mxu1 %v7910_v8  ;;  %v5820_v7 = vunpack.i.l.bf16 %v5819_v50  ;;  %v5821_v26 = vunpack.i.h.bf16 %v5819_v50 }
 0x2bc   : > { %3673 = vmatprep.mubr.f32.mxu1 %v3438_v3  ;;  %5437 = vmatpush3.bf16.msra.mxu1 %v5436_v35  ;;  %v7944_v35 = vsel %vm3415_vm1, %v7443_v53, %v5816_v24 }
 0x2bd   : > { %5439 = vmatprep.subr.bf16.mxu1 %v5438_v6  ;;  %v3440_v18 = vsel %vm3415_vm1, %v7730_v38, %v5820_v7  ;;  %v7952_v32 = vsel %vm3415_vm1, %v7480_v12, %v5821_v26 }
 0x2be   : > { %v5824_v13 = vpop.permute.xlu1 %5823 }
 0x2bf   : > { %3674 = vmatmul.mubr.f32.gmra.mrb[42].mxu1 %v7929_v17  ;;  %v5825_v6 = vunpack.i.l.bf16 %v5824_v13  ;;  %v5826_v25 = vunpack.i.h.bf16 %v5824_v13 }
 0x2c0   : > { %3678 = vmatprep.mubr.f32.mxu1 %v3439_v49  ;;  %5441 = vmatpush3.bf16.msra.mxu1 %v5440_v56 }
 0x2c1   : > { %5443 = vmatprep.subr.bf16.mxu1 %v5442_v4  ;;  %v3441_v53 = vsel %vm3415_vm1, %v7727_v0, %v5825_v6  ;;  %v7959_v50 = vsel %vm3415_vm1, %v7467_v33, %v5826_v25 }
 0x2c2   : > { %v5829_v40 = vpop.permute.xlu0 %5828  ;;  %v5834_v23 = vpop.permute.xlu1 %5833 }
 0x2c3   : > { %3679 = vmatmul.mubr.f32.gmra.mrb[44].mxu1 %v7944_v35  ;;  %v5830_v10 = vunpack.i.l.bf16 %v5829_v40  ;;  %v5831_v3 = vunpack.i.h.bf16 %v5829_v40  ;;  %v5835_v56 = vunpack.i.l.bf16 %v5834_v23  ;;  %v5836_v29 = vunpack.i.h.bf16 %v5834_v23 }
 0x2c4   : > { %3683 = vmatprep.mubr.f32.mxu1 %v3440_v18  ;;  %5445 = vmatpush3.bf16.msra.mxu1 %v5444_v41 }
 0x2c5   : > { %5447 = vmatprep.subr.bf16.mxu1 %v7940_v15  ;;  %v3442_v12 = vsel %vm3415_vm1, %v7747_v51, %v5830_v10  ;;  %v7966_v5 = vsel %vm3415_vm1, %v7499_v52, %v5831_v3  ;;  %v3443_v33 = vsel %vm3415_vm1, %v7739_v63, %v5835_v56  ;;  %v7973_v7 = vsel %vm3415_vm1, %v7536_v43, %v5836_v29  ;;  %v3534_v56 = vld [vmem:[%s8291_s3 + $0x210] sm:$0xff] }
 0x2c6   : > { %v5839_v4 = vpop.permute.xlu0 %5838 }
 0x2c7   : > { %3684 = vmatmul.mubr.f32.gmra.mrb[46].mxu1 %v7952_v32  ;;  %v5840_v24 = vunpack.i.l.bf16 %v5839_v4  ;;  %v5841_v16 = vunpack.i.h.bf16 %v5839_v4 }
 0x2c8   : > { %3688 = vmatprep.mubr.f32.mxu1 %v3441_v53 }
 0x2c9   : > { %v3444_v52 = vsel %vm3415_vm1, %v7760_v59, %v5840_v24  ;;  %v7980_v26 = vsel %vm3415_vm1, %v7573_v28, %v5841_v16  ;;  %v3537_v24 = vld [vmem:[%s8291_s3 + $0x228] sm:$0xff]  ;;  %v3539_v16 = vld [vmem:[%s8291_s3 + $0x238] sm:$0xff] }
 0x2ca   : > { %v5844_v48 = vpop.permute.xlu1 %5843 }
 0x2cb   : > { %3689 = vmatmul.mubr.f32.gmra.mrb[48].mxu1 %v7959_v50  ;;  %v5845_v49 = vunpack.i.l.bf16 %v5844_v48  ;;  %v5846_v41 = vunpack.i.h.bf16 %v5844_v48 }
 0x2cc   : > { %3693 = vmatprep.mubr.f32.mxu1 %v3442_v12  ;;  %v3535_v12 = vld [vmem:[%s8291_s3 + $0x218] sm:$0xff] }
 0x2cd   : > { %v3445_v43 = vsel %vm3415_vm1, %v7757_v46, %v5845_v49  ;;  %v7987_v25 = vsel %vm3415_vm1, %v7560_v27, %v5846_v41  ;;  %v5450_v4 = vpack.c.bf16 %v3535_v12, %v3534_v56 }
 0x2ce   : > { %v5849_v13 = vpop.permute.xlu0 %5848  ;;  %v5854_v18 = vpop.permute.xlu1 %5853 }
 0x2cf   : > { %3694 = vmatmul.mubr.f32.gmra.mrb[50].mxu1 %v7966_v5  ;;  %v5850_v6 = vunpack.i.l.bf16 %v5849_v13  ;;  %v5851_v40 = vunpack.i.h.bf16 %v5849_v13  ;;  %v5855_v10 = vunpack.i.l.bf16 %v5854_v18  ;;  %v5856_v53 = vunpack.i.h.bf16 %v5854_v18 }
 0x2d0   : > { %3698 = vmatprep.mubr.f32.mxu1 %v3443_v33 }
 0x2d1   : > { %v3446_v28 = vsel %vm3415_vm1, %v7779_v57, %v5850_v6  ;;  %v7994_v23 = vsel %vm3415_vm1, %v7591_v62, %v5851_v40  ;;  %v3447_v3 = vsel %vm3415_vm1, %v7782_v1, %v5855_v10  ;;  %v8001_v27 = vsel %vm3415_vm1, %v7625_v22, %v5856_v53  ;;  %v3536_v22 = vld [vmem:[%s8291_s3 + $0x220] sm:$0xff] }
 0x2d2   : > { %v3356_v62 = vpop.permute.xlu0 %3355  ;;  %v3358_v33 = vpop.permute.xlu1 %3357 }
 0x2d3   : > { %3699 = vmatmul.mubr.f32.gmra.mrb[52].mxu1 %v7973_v7  ;;  %v3448_v29 = vsel %vm3415_vm1, %v7372_v21, %v3356_v62  ;;  %v3449_v48 = vsel %vm3415_vm1, %v7395_v44, %v3358_v33  ;;  %v3538_v21 = vld [vmem:[%s8291_s3 + $0x230] sm:$0xff]  ;;  %v8446_v62 = vld [vmem:[#allocation18_spill] sm:$0xff] }
 0x2d4   : > { %3703 = vmatprep.mubr.f32.mxu1 %v3444_v52 }
 0x2d6   : > { %v3360_v49 = vpop.permute.xlu0 %3359  ;;  %v3362_v52 = vpop.permute.xlu1 %3361 }
 0x2d7   : > { %3704 = vmatmul.mubr.f32.gmra.mrb[54].mxu1 %v7980_v26  ;;  %v3451_v44 = vsel %vm3415_vm1, %v7437_v34, %v3362_v52 }
 0x2d8   : > { %3708 = vmatprep.mubr.f32.mxu1 %v3445_v43 }
 0x2da   : > { %v3364_v13 = vpop.permute.xlu0 %3363  ;;  %v3366_v41 = vpop.permute.xlu1 %3365 }
 0x2db   : > { %3709 = vmatmul.mubr.f32.gmra.mrb[56].mxu1 %v7987_v25 }
 0x2dc   : > { %3713 = vmatprep.mubr.f32.mxu1 %v3446_v28 }
 0x2de   : > { %v3370_v34 = vpop.permute.xlu1 %3369 }
 0x2df   : > { %3714 = vmatmul.mubr.f32.gmra.mrb[58].mxu1 %v7994_v23 }
 0x2e0   : > { %3718 = vmatprep.mubr.f32.mxu1 %v3447_v3 }
 0x2e3   : > { %3719 = vmatmul.mubr.f32.gmra.mrb[60].mxu1 %v8001_v27 }
 0x2e4   : > { %3788 = vmatprep.mubr.f32.mxu1 %v7891_v39  ;;  %v5454_v39 = vpack.c.bf16 %v3537_v24, %v3536_v22 }
 0x2e7   : > { %3789 = vmatmul.mubr.f32.vlgmr.msra.gmra.mrb[62].mxu1 %v3448_v29  ;;  %v8448_v29 = vld [vmem:[#allocation21_spill] sm:$0xff] }
 0x2e8   : > { %5449 = vmatpush3.bf16.msra.mxu1 %v7940_v15  ;;  %3793 = vmatprep.mubr.f32.mxu1 %v7910_v8  ;;  %v5458_v8 = vpack.c.bf16 %v3539_v16, %v3538_v21  ;;  %v3450_v15 = vsel %vm3415_vm1, %v7402_v19, %v3360_v49  ;;  %v3368_v19 = vpop.permute.xlu0 %3367 }
 0x2e9   : > { %5451 = vmatprep.subr.bf16.mxu1 %v5450_v4  ;;  %v3454_v6 = vsel %vm3415_vm1, %v7505_v37, %v3368_v19 }
 0x2eb   : > { %3794 = vmatmul.mubr.f32.gmra.mrb[64].mxu1 %v3449_v48 }
 0x2ec   : > { %3798 = vmatprep.mubr.f32.mxu1 %v7929_v17  ;;  %5453 = vmatpush3.bf16.msra.mxu1 %v5450_v4  ;;  %v3452_v17 = vsel %vm3415_vm1, %v7475_v36, %v3364_v13  ;;  %v3455_v36 = vsel %vm3415_vm1, %v7530_v30, %v3370_v34  ;;  %v8447_v4 = vld [vmem:[#allocation12_spill] sm:$0xff] }
 0x2ed   : > { %5455 = vmatprep.subr.bf16.mxu1 %v5454_v39 }
 0x2ef   : > { %3799 = vmatmul.mubr.f32.gmra.mrb[66].mxu1 %v3450_v15 }
 0x2f0   : > { %3803 = vmatprep.mubr.f32.mxu1 %v7944_v35  ;;  %5457 = vmatpush3.bf16.msra.mxu1 %v5454_v39  ;;  %v3453_v35 = vsel %vm3415_vm1, %v7472_v60, %v3366_v41 }
 0x2f1   : > { %5459 = vmatprep.subr.bf16.mxu1 %v5458_v8 }
 0x2f3   : > { %3804 = vmatmul.mubr.f32.gmra.mrb[68].mxu1 %v3451_v44 }
 0x2f4   : > { %3808 = vmatprep.mubr.f32.mxu1 %v7952_v32  ;;  %5461 = vmatpush3.bf16.msra.mxu1 %v5458_v8  ;;  %v3372_v32 = vpop.permute.xlu0 %3371 }
 0x2f5   : > { %v3456_v60 = vsel %vm3415_vm1, %v7568_v47, %v3372_v32 }
 0x2f7   : > { %3809 = vmatmul.mubr.f32.gmra.mrb[70].mxu1 %v3452_v17 }
 0x2f8   : > { %3813 = vmatprep.mubr.f32.mxu1 %v7959_v50  ;;  %v3374_v50 = vpop.permute.xlu1 %3373  ;;  %v3376_v43 = vpop.permute.xlu0 %3375 }
 0x2f9   : > { %v3457_v37 = vsel %vm3415_vm1, %v7565_v31, %v3374_v50  ;;  %v3458_v30 = vsel %vm3415_vm1, %v7597_v2, %v3376_v43 }
 0x2fb   : > { %3814 = vmatmul.mubr.f32.gmra.mrb[72].mxu1 %v3453_v35 }
 0x2fc   : > { %3818 = vmatprep.mubr.f32.mxu1 %v7966_v5  ;;  %v3378_v5 = vpop.permute.xlu1 %3377 }
 0x2fd   : > { %v3459_v40 = vsel %vm3415_vm1, %v7620_v58, %v3378_v5 }
 0x2ff   : > { %3819 = vmatmul.mubr.f32.gmra.mrb[74].mxu1 %v3454_v6 }
 0x300   : > { %3823 = vmatprep.mubr.f32.mxu1 %v7973_v7  ;;  %v5859_v7 = vpop.permute.xlu0 %5858 }
 0x301   : > { %v5860_v18 = vunpack.i.l.bf16 %v5859_v7  ;;  %v5861_v47 = vunpack.i.h.bf16 %v5859_v7 }
 0x303   : > { %3824 = vmatmul.mubr.f32.gmra.mrb[76].mxu1 %v3455_v36  ;;  %v3464_v31 = vsel %vm3415_vm1, %v7650_v11, %v5860_v18  ;;  %v3460_v2 = vsel %vm3415_vm1, %v7648_v55, %v5861_v47 }
 0x304   : > { %3828 = vmatprep.mubr.f32.mxu1 %v7980_v26  ;;  %v5864_v26 = vpop.permute.xlu1 %5863  ;;  %v5869_v10 = vpop.permute.xlu0 %5868 }
 0x305   : > { %v5866_v28 = vunpack.i.h.bf16 %v5864_v26  ;;  %v5870_v53 = vunpack.i.l.bf16 %v5869_v10 }
 0x307   : > { %3829 = vmatmul.mubr.f32.gmra.mrb[78].mxu1 %v3456_v60  ;;  %v3461_v58 = vsel %vm3415_vm1, %v7645_v42, %v5866_v28  ;;  %v3466_v11 = vsel %vm3415_vm1, %v7668_v45, %v5870_v53  ;;  %v3255_v42 = vrot.slane %v8447_v4, 2 }
 0x308   : > { %3833 = vmatprep.mubr.f32.mxu1 %v7987_v25  ;;  %v5865_v25 = vunpack.i.l.bf16 %v5864_v26  ;;  %v5874_v3 = vpop.permute.xlu1 %5873 }
 0x309   : > { %v5875_v56 = vunpack.i.l.bf16 %v5874_v3  ;;  %v5876_v12 = vunpack.i.h.bf16 %v5874_v3 }
 0x30b   : > { %3834 = vmatmul.mubr.f32.gmra.mrb[80].mxu1 %v3457_v37  ;;  %v3463_v22 = vsel %vm3415_vm1, %v8448_v29, %v5876_v12 }
 0x30c   : > { %3838 = vmatprep.mubr.f32.mxu1 %v7994_v23  ;;  %v3465_v23 = vsel %vm3415_vm1, %v7641_v20, %v5865_v25  ;;  %v3467_v20 = vsel %vm3415_vm1, %v8447_v4, %v5875_v56 }
 0x30f   : > { %3839 = vmatmul.mubr.f32.gmra.mrb[82].mxu1 %v3458_v30 }
 0x310   : > { %3843 = vmatprep.mubr.f32.mxu1 %v8001_v27  ;;  %v5871_v27 = vunpack.i.h.bf16 %v5869_v10 }
 0x312   : > { %v3462_v55 = vsel %vm3415_vm1, %v8446_v62, %v5871_v27 }
 0x313   : > { %3844 = vmatmul.mubr.f32.gmra.mrb[84].mxu1 %v3459_v40 }
 0x314   : > { %3848 = vmatprep.mubr.f32.mxu1 %v3464_v31 }
 0x317   : > { %3849 = vmatmul.mubr.f32.gmra.mrb[86].mxu1 %v3460_v2 }
 0x318   : > { %3853 = vmatprep.mubr.f32.mxu1 %v3465_v23 }
 0x31b   : > { %3854 = vmatmul.mubr.f32.gmra.mrb[88].mxu1 %v3461_v58 }
 0x31c   : > { %3858 = vmatprep.mubr.f32.mxu1 %v3466_v11  ;;  %v8131_v11 = vld [vmem:[%s8292_s4] ss:$0 sm:$0xff] }
 0x31f   : > { %3859 = vmatmul.mubr.f32.gmra.mrb[90].mxu1 %v3462_v55 }
 0x320   : > { %3863 = vmatprep.mubr.f32.mxu1 %v3467_v20 }
 0x323   : > { %3864 = vmatmul.mubr.f32.gmra.mrb[92].mxu1 %v3463_v22 }
 0x324   : > { %5358 = vmatprep.mubr.msk.f32.mxu1 %vm3415_vm1, %v7704_v14  ;;  %v3254_v14 = vrot.slane %v7668_v45, 2 }
 0x327   : > { %5359 = vmatmul.mubr.msk.f32.vlgmr.msra.gmra.mrb[94].mxu1 %vm3415_vm1, %v7701_v61  ;;  %v8449_v61 = vld [vmem:[#allocation14_spill] sm:$0xff] }
 0x328   : > { %5361 = vmatprep.mubr.msk.f32.mxu1 %vm3415_vm1, %v7716_v54 }
 0x32b   : > { %5362 = vmatmul.mubr.msk.f32.gmra.mrb[96].mxu1 %vm3415_vm1, %v7712_v9  ;;  %v8450_v9 = vld [vmem:[#allocation10_spill] sm:$0xff] }
 0x32c   : > { %5364 = vmatprep.mubr.msk.f32.mxu1 %vm3415_vm1, %v7730_v38  ;;  %v3257_v54 = vrot.slane %v8450_v9, 2  ;;  %v3256_v38 = vsel %vm954_vm2, %v3254_v14, %v3255_v42 }
 0x32f   : > { %5365 = vmatmul.mubr.msk.f32.gmra.mrb[98].mxu1 %vm3415_vm1, %v7727_v0  ;;  %v8451_v0 = vld [vmem:[#allocation13_spill] sm:$0xff] }
 0x330   : > { %5367 = vmatprep.mubr.msk.f32.mxu1 %vm3415_vm1, %v7747_v51 }
 0x333   : > { %5368 = vmatmul.mubr.msk.f32.gmra.mrb[100].mxu1 %vm3415_vm1, %v7739_v63  ;;  %v3258_v63 = vsel %vm954_vm2, %v3255_v42, %v3257_v54 }
 0x334   : > { %5370 = vmatprep.mubr.msk.f32.mxu1 %vm3415_vm1, %v7760_v59 }
 0x337   : > { %5371 = vmatmul.mubr.msk.f32.gmra.mrb[102].mxu1 %vm3415_vm1, %v7757_v46 }
 0x338   : > { %5373 = vmatprep.mubr.msk.f32.mxu1 %vm3415_vm1, %v7779_v57 }
 0x33b   : > { %5374 = vmatmul.mubr.msk.f32.gmra.mrb[104].mxu1 %vm3415_vm1, %v7782_v1 }
 0x33c   : > { %5376 = vmatprep.mubr.msk.f32.mxu1 %vm3415_vm1, %v8449_v61 }
 0x33f   : > { %5377 = vmatmul.mubr.msk.f32.gmra.mrb[106].mxu1 %vm3415_vm1, %v8451_v0 }
 0x340   : > { %5379 = vmatprep.mubr.msk.f32.mxu1 %vm3415_vm1, %v3256_v38 }
 0x343   : > { %5380 = vmatmul.mubr.msk.f32.gmra.mrb[108].mxu1 %vm3415_vm1, %v3258_v63 }
 0x379   : > { %v4767_v51 = vpop.f32.mrb[30].mxu1 }
 0x37a   : > { %v4768_v46 = vpop.f32.mrb[31].mxu1 }
 0x37b   : > { %v4769_v59 = vadd.f32 %v4768_v46, %v4767_v51 }
 0x37d   : > { %v3646_v55 = vadd.f32 %v4769_v59, %v8131_v11 }
 0x37e   : > { %v4770_v57 = vpop.f32.mrb[32].mxu1 }
 0x37f   : > { %v4771_v1 = vpop.f32.mrb[33].mxu1 }
 0x380   : > { %v4772_v24 = vadd.f32 %v4771_v1, %v4770_v57 }
 0x382   : > { %v4773_v45 = vpop.f32.mrb[34].mxu1  ;;  %v3651_v42 = vadd.f32 %v4772_v24, %v8131_v11 }
 0x383   : > { %v4774_v33 = vpop.f32.mrb[35].mxu1 }
 0x384   : > { %v4775_v39 = vadd.f32 %v4774_v33, %v4773_v45 }
 0x386   : > { %v4776_v48 = vpop.f32.mrb[36].mxu1  ;;  %v3656_v0 = vadd.f32 %v4775_v39, %v8131_v11 }
 0x387   : > { %v4777_v21 = vpop.f32.mrb[37].mxu1 }
 0x388   : > { %v4778_v16 = vadd.f32 %v4777_v21, %v4776_v48 }
 0x38a   : > { %v4779_v49 = vpop.f32.mrb[38].mxu1  ;;  %v3661_v59 = vadd.f32 %v4778_v16, %v8131_v11 }
 0x38b   : > { %v4780_v8 = vpop.f32.mrb[39].mxu1 }
 0x38c   : > { %v4781_v15 = vadd.f32 %v4780_v8, %v4779_v49 }
 0x38e   : > { %v4782_v52 = vpop.f32.mrb[40].mxu1  ;;  %v3666_v24 = vadd.f32 %v4781_v15, %v8131_v11 }
 0x38f   : > { %v4783_v44 = vpop.f32.mrb[41].mxu1 }
 0x390   : > { %v4784_v13 = vadd.f32 %v4783_v44, %v4782_v52 }
 0x392   : > { %v4785_v17 = vpop.f32.mrb[42].mxu1  ;;  %v3671_v39 = vadd.f32 %v4784_v13, %v8131_v11 }
 0x393   : > { %v4786_v41 = vpop.f32.mrb[43].mxu1 }
 0x394   : > { %v4787_v19 = vadd.f32 %v4786_v41, %v4785_v17 }
 0x396   : > { %v4788_v35 = vpop.f32.mrb[44].mxu1  ;;  %v3676_v16 = vadd.f32 %v4787_v19, %v8131_v11 }
 0x397   : > { %v4789_v34 = vpop.f32.mrb[45].mxu1 }
 0x398   : > { %v8110_v6 = vadd.f32 %v4789_v34, %v4788_v35 }
 0x39a   : > { %v4791_v32 = vpop.f32.mrb[46].mxu1  ;;  %v3681_v15 = vadd.f32 %v8110_v6, %v8131_v11 }
 0x39b   : > { %v4792_v36 = vpop.f32.mrb[47].mxu1 }
 0x39c   : > { %v8112_v50 = vadd.f32 %v4792_v36, %v4791_v32 }
 0x39e   : > { %v4794_v43 = vpop.f32.mrb[48].mxu1 }
 0x39f   : > { %v4795_v60 = vpop.f32.mrb[49].mxu1 }
 0x3a0   : > { %v8114_v5 = vadd.f32 %v4795_v60, %v4794_v43 }
 0x3a2   : > { %v4797_v37 = vpop.f32.mrb[50].mxu1 }
 0x3a3   : > { %v4798_v7 = vpop.f32.mrb[51].mxu1 }
 0x3a4   : > { %v8116_v30 = vadd.f32 %v4798_v7, %v4797_v37  ;;  %v3686_v7 = vadd.f32 %v8112_v50, %v8131_v11 }
 0x3a6   : > { %v4800_v18 = vpop.f32.mrb[52].mxu1 }
 0x3a7   : > { %v4801_v26 = vpop.f32.mrb[53].mxu1 }
 0x3a8   : > { %v8118_v47 = vadd.f32 %v4801_v26, %v4800_v18 }
 0x3aa   : > { %v4803_v40 = vpop.f32.mrb[54].mxu1 }
 0x3ab   : > { %v4804_v25 = vpop.f32.mrb[55].mxu1 }
 0x3ac   : > { %v8120_v31 = vadd.f32 %v4804_v25, %v4803_v40  ;;  %v3691_v25 = vadd.f32 %v8114_v5, %v8131_v11 }
 0x3ae   : > { %v4806_v10 = vpop.f32.mrb[56].mxu1 }
 0x3af   : > { %v4807_v28 = vpop.f32.mrb[57].mxu1 }
 0x3b0   : > { %v8122_v2 = vadd.f32 %v4807_v28, %v4806_v10 }
 0x3b2   : > { %v4809_v53 = vpop.f32.mrb[58].mxu1 }
 0x3b3   : > { %v4810_v23 = vpop.f32.mrb[59].mxu1 }
 0x3b4   : > { %v8124_v3 = vadd.f32 %v4810_v23, %v4809_v53  ;;  %v3696_v23 = vadd.f32 %v8116_v30, %v8131_v11 }
 0x3b6   : > { %v4812_v27 = vpop.f32.mrb[60].mxu1 }
 0x3b7   : > { %v4813_v58 = vpop.f32.mrb[61].mxu1 }
 0x3b8   : > { %v8126_v56 = vadd.f32 %v4813_v58, %v4812_v27 }
 0x3ba   : > { %v4847_v12 = vpop.f32.mrb[62].mxu1 }
 0x3bb   : > { %v4848_v62 = vpop.f32.mrb[63].mxu1 }
 0x3bc   : > { %v4849_v4 = vadd.f32 %v4848_v62, %v4847_v12  ;;  %v3701_v62 = vadd.f32 %v8118_v47, %v8131_v11 }
 0x3be   : > { %v4850_v20 = vpop.f32.mrb[64].mxu1  ;;  %v8134_v29 = vadd.f32 %v4849_v4, %v3646_v55 }
 0x3bf   : > { %v4851_v22 = vpop.f32.mrb[65].mxu1 }
 0x3c0   : > { %v4852_v61 = vadd.f32 %v4851_v22, %v4850_v20  ;;  %v3706_v22 = vadd.f32 %v8120_v31, %v8131_v11 }
 0x3c2   : > { %v4853_v14 = vpop.f32.mrb[66].mxu1  ;;  %v8137_v9 = vadd.f32 %v4852_v61, %v3651_v42 }
 0x3c3   : > { %v4854_v54 = vpop.f32.mrb[67].mxu1 }
 0x3c4   : > { %v4855_v38 = vadd.f32 %v4854_v54, %v4853_v14  ;;  %v3711_v54 = vadd.f32 %v8122_v2, %v8131_v11 }
 0x3c6   : > { %v4856_v63 = vpop.f32.mrb[68].mxu1  ;;  %v8140_v51 = vadd.f32 %v4855_v38, %v3656_v0 }
 0x3c7   : > { %v4857_v46 = vpop.f32.mrb[69].mxu1 }
 0x3c8   : > { %v4858_v57 = vadd.f32 %v4857_v46, %v4856_v63  ;;  %v3716_v46 = vadd.f32 %v8124_v3, %v8131_v11 }
 0x3ca   : > { %v4859_v1 = vpop.f32.mrb[70].mxu1  ;;  %v8143_v45 = vadd.f32 %v4858_v57, %v3661_v59 }
 0x3cb   : > { %v4860_v33 = vpop.f32.mrb[71].mxu1 }
 0x3cc   : > { %v4861_v48 = vadd.f32 %v4860_v33, %v4859_v1  ;;  %v3721_v33 = vadd.f32 %v8126_v56, %v8131_v11 }
 0x3ce   : > { %v4862_v21 = vpop.f32.mrb[72].mxu1  ;;  %v8146_v49 = vadd.f32 %v4861_v48, %v3666_v24 }
 0x3cf   : > { %v4863_v8 = vpop.f32.mrb[73].mxu1 }
 0x3d0   : > { %v4864_v52 = vadd.f32 %v4863_v8, %v4862_v21 }
 0x3d2   : > { %v4865_v44 = vpop.f32.mrb[74].mxu1  ;;  %v8149_v17 = vadd.f32 %v4864_v52, %v3671_v39 }
 0x3d3   : > { %v4866_v41 = vpop.f32.mrb[75].mxu1 }
 0x3d4   : > { %v4867_v35 = vadd.f32 %v4866_v41, %v4865_v44 }
 0x3d6   : > { %v4868_v34 = vpop.f32.mrb[76].mxu1  ;;  %v8152_v32 = vadd.f32 %v4867_v35, %v3676_v16 }
 0x3d7   : > { %v4869_v36 = vpop.f32.mrb[77].mxu1 }
 0x3d8   : > { %v4870_v43 = vadd.f32 %v4869_v36, %v4868_v34 }
 0x3da   : > { %v4871_v60 = vpop.f32.mrb[78].mxu1  ;;  %v8156_v37 = vadd.f32 %v4870_v43, %v3681_v15 }
 0x3db   : > { %v4872_v13 = vpop.f32.mrb[79].mxu1 }
 0x3dc   : > { %v4873_v18 = vadd.f32 %v4872_v13, %v4871_v60 }
 0x3de   : > { %v4874_v26 = vpop.f32.mrb[80].mxu1  ;;  %v8160_v40 = vadd.f32 %v4873_v18, %v3686_v7 }
 0x3df   : > { %v4875_v19 = vpop.f32.mrb[81].mxu1 }
 0x3e0   : > { %v4876_v10 = vadd.f32 %v4875_v19, %v4874_v26 }
 0x3e2   : > { %v4877_v28 = vpop.f32.mrb[82].mxu1  ;;  %v8164_v53 = vadd.f32 %v4876_v10, %v3691_v25 }
 0x3e3   : > { %v4878_v6 = vpop.f32.mrb[83].mxu1 }
 0x3e4   : > { %v4879_v27 = vadd.f32 %v4878_v6, %v4877_v28 }
 0x3e6   : > { %v4880_v58 = vpop.f32.mrb[84].mxu1  ;;  %v8168_v12 = vadd.f32 %v4879_v27, %v3696_v23 }
 0x3e7   : > { %v4881_v50 = vpop.f32.mrb[85].mxu1 }
 0x3e8   : > { %v4882_v55 = vadd.f32 %v4881_v50, %v4880_v58 }
 0x3ea   : > { %v4883_v4 = vpop.f32.mrb[86].mxu1  ;;  %v8172_v5 = vadd.f32 %v4882_v55, %v3701_v62 }
 0x3eb   : > { %v4884_v20 = vpop.f32.mrb[87].mxu1 }
 0x3ec   : > { %v4885_v42 = vadd.f32 %v4884_v20, %v4883_v4 }
 0x3ee   : > { %v4886_v61 = vpop.f32.mrb[88].mxu1  ;;  %v8176_v30 = vadd.f32 %v4885_v42, %v3706_v22 }
 0x3ef   : > { %v4887_v14 = vpop.f32.mrb[89].mxu1 }
 0x3f0   : > { %v4888_v0 = vadd.f32 %v4887_v14, %v4886_v61 }
 0x3f2   : > { %v4889_v47 = vpop.f32.mrb[90].mxu1  ;;  %v8180_v38 = vadd.f32 %v4888_v0, %v3711_v54 }
 0x3f3   : > { %v4890_v63 = vpop.f32.mrb[91].mxu1 }
 0x3f4   : > { %v4891_v59 = vadd.f32 %v4890_v63, %v4889_v47 }
 0x3f6   : > { %v4892_v57 = vpop.f32.mrb[92].mxu1  ;;  %v8185_v31 = vadd.f32 %v4891_v59, %v3716_v46 }
 0x3f7   : > { %v4893_v1 = vpop.f32.mrb[93].mxu1 }
 0x3f8   : > { %v4894_v24 = vadd.f32 %v4893_v1, %v4892_v57 }
 0x3fa   : > { %v5360_v2 = vpop.f32.mrb[94].mxu1  ;;  %v3866_v48 = vadd.f32 %v4894_v24, %v3721_v33 }
 0x3fb   : > { %v3941_v21 = vadd.f32 %v5360_v2, %v8137_v9  ;;  %v3935_v8 = vpop.f32.mrb[95].mxu1 }
 0x3fc   : > { %v3936_v39 = vadd.f32 %v3935_v8, %v8134_v29 }
 0x3fd   : > { %v4015_v3 = vmax.f32 %v3941_v21, 0.0 }
 0x3fe   : > { %v4014_v52 = vmax.f32 %v3936_v39, 0.0  ;;  %v5363_v44 = vpop.f32.mrb[96].mxu1 }
 0x3ff   : > { %4031 = vst [vmem:[%s8193_s9 + $0x8] sm:$0xff] %v4015_v3  ;;  %v3951_v56 = vadd.f32 %v5363_v44, %v8143_v45  ;;  %v3945_v11 = vpop.f32.mrb[97].mxu1 }
 0x400   : > { %4030 = vst [vmem:[%s8193_s9] sm:$0xff] %v4014_v52  ;;  %v3946_v9 = vadd.f32 %v3945_v11, %v8140_v51 }
 0x401   : > { %v4017_v41 = vmax.f32 %v3951_v56, 0.0 }
 0x402   : > { %v4016_v29 = vmax.f32 %v3946_v9, 0.0  ;;  %v5366_v16 = vpop.f32.mrb[98].mxu1 }
 0x403   : > { %4033 = vst [vmem:[%s8193_s9 + $0x18] sm:$0xff] %v4017_v41  ;;  %v3961_v35 = vadd.f32 %v5366_v16, %v8149_v17  ;;  %v3955_v34 = vpop.f32.mrb[99].mxu1 }
 0x404   : > { %4032 = vst [vmem:[%s8193_s9 + $0x10] sm:$0xff] %v4016_v29  ;;  %v3956_v36 = vadd.f32 %v3955_v34, %v8146_v49 }
 0x405   : > { %v4019_v15 = vmax.f32 %v3961_v35, 0.0 }
 0x406   : > { %v4018_v43 = vmax.f32 %v3956_v36, 0.0  ;;  %v5369_v45 = vpop.f32.mrb[100].mxu1 }
 0x407   : > { %4035 = vst [vmem:[%s8193_s9 + $0x28] sm:$0xff] %v4019_v15  ;;  %v3971_v60 = vadd.f32 %v5369_v45, %v8156_v37  ;;  %v3965_v51 = vpop.f32.mrb[101].mxu1 }
 0x408   : > { %4034 = vst [vmem:[%s8193_s9 + $0x20] sm:$0xff] %v4018_v43  ;;  %v3966_v13 = vadd.f32 %v3965_v51, %v8152_v32 }
 0x409   : > { %v4021_v7 = vmax.f32 %v3971_v60, 0.0 }
 0x40a   : > { %v4020_v17 = vmax.f32 %v3966_v13, 0.0  ;;  %v5372_v18 = vpop.f32.mrb[102].mxu1 }
 0x40b   : > { %4037 = vst [vmem:[%s8193_s9 + $0x38] sm:$0xff] %v4021_v7  ;;  %v3981_v49 = vadd.f32 %v5372_v18, %v8164_v53  ;;  %v3975_v26 = vpop.f32.mrb[103].mxu1 }
 0x40c   : > { %4036 = vst [vmem:[%s8193_s9 + $0x30] sm:$0xff] %v4020_v17  ;;  %v3976_v19 = vadd.f32 %v3975_v26, %v8160_v40 }
 0x40d   : > { %v4023_v25 = vmax.f32 %v3981_v49, 0.0 }
 0x40e   : > { %v4022_v37 = vmax.f32 %v3976_v19, 0.0  ;;  %v5375_v10 = vpop.f32.mrb[104].mxu1 }
 0x40f   : > { %4039 = vst [vmem:[%s8193_s9 + $0x48] sm:$0xff] %v4023_v25  ;;  %v3991_v32 = vadd.f32 %v5375_v10, %v8172_v5  ;;  %v3985_v28 = vpop.f32.mrb[105].mxu1 }
 0x410   : > { %4038 = vst [vmem:[%s8193_s9 + $0x40] sm:$0xff] %v4022_v37  ;;  %v3986_v6 = vadd.f32 %v3985_v28, %v8168_v12 }
 0x411   : > { %v4025_v53 = vmax.f32 %v3991_v32, 0.0 }
 0x412   : > { %v4024_v23 = vmax.f32 %v3986_v6, 0.0  ;;  %v5378_v27 = vpop.f32.mrb[106].mxu1 }
 0x413   : > { %4041 = vst [vmem:[%s8193_s9 + $0x58] sm:$0xff] %v4025_v53  ;;  %v4001_v40 = vadd.f32 %v5378_v27, %v8180_v38  ;;  %v3995_v58 = vpop.f32.mrb[107].mxu1 }
 0x414   : > { %4040 = vst [vmem:[%s8193_s9 + $0x50] sm:$0xff] %v4024_v23  ;;  %v3996_v50 = vadd.f32 %v3995_v58, %v8176_v30 }
 0x415   : > { %v4027_v62 = vmax.f32 %v4001_v40, 0.0 }
 0x416   : > { %v4026_v12 = vmax.f32 %v3996_v50, 0.0  ;;  %v5381_v55 = vpop.f32.mrb[108].mxu1 }
 0x417   : > { %4043 = vst [vmem:[%s8193_s9 + $0x68] sm:$0xff] %v4027_v62  ;;  %v4011_v4 = vadd.f32 %v5381_v55, %v3866_v48  ;;  %v4005_v5 = vpop.f32.mrb[109].mxu1 }
 0x418   : > { %4042 = vst [vmem:[%s8193_s9 + $0x60] sm:$0xff] %v4026_v12  ;;  %v4006_v20 = vadd.f32 %v4005_v5, %v8185_v31 }
 0x419   : > { %v4029_v22 = vmax.f32 %v4011_v4, 0.0 }
 0x41a   : > { %v4028_v42 = vmax.f32 %v4006_v20, 0.0 }
 0x41b   : > { %4045 = vst [vmem:[%s8193_s9 + $0x78] sm:$0xff] %v4029_v22 }
 0x41c   : > { %4044 = vst [vmem:[%s8193_s9 + $0x70] sm:$0xff] %v4028_v42 }
 0x41d   : > { %5890 = shalt.err (!%p5887_p6)
}
 0x41e   : > { %s5891_s30 = scalar_lea.hbm %s8228_s16, 2048  ;;  %s5895_s13 = scalar_lea.hbm %s8293_s5, 8192 }
 0x41f   : > { %p5892_p7 = scmp.ne.s32.totalorder %s8228_s16, %s5891_s30  ;;  %p5896_p11 = scmp.lt.u32.totalorder %s8228_s16, %s8293_s5 }
 0x420   : > { %p5897_p12 = scmp.lt.u32.totalorder %s5895_s13, %s5891_s30  ;;  %p5899_p0 = scmp.lt.u32.totalorder %s5891_s30, %s8228_s16 }
 0x421   : > { %p5893_p9 = pnand %p5892_p7, %p6058_p3 }
 0x422   : > { %p5898_p13 = por %p5897_p12, %p5896_p11 }
 0x423   : > { %p5894_p10 = pneg %p5893_p9 }
 0x424   : > { %p5900_p1 = por %p5899_p0, %p5898_p13 }
 0x426   : > { %p5901_p2 = pnand %p5900_p1, %p5894_p10 }
 0x428   : > { %5904 = shalt.err (!%p5901_p2)
}
 0x429   : > { %s5975_s15 = smov 128   ;;  %s5976_s26 = smov 8  }
 0x42a   : > { %5703 = dma.vmem_to_hbm [thread:$0]  (%p6058_p3), %s8230_s22, 2048, %s8228_s16, %s8236_s17, %s5975_s15, %s5975_s15, %s5976_s26  }
 0x42b PF: > { %p5709_p4 = scmp.ge.s32.totalorder %s5971_s25, 2  ;;  %s4077_s27 = sand.u32 1, %s5943_s18  }
 0x42c   : > { %s4078_s8 = scalar_lea.sflag [#allocation3], %s4077_s27 }
 0x42d   : > { %p5706_p5 = pnand %p5709_p4, %p6067_p8 }
 0x42f   : > { %5938 = dma.done.wait (!%p5706_p5), %s4078_s8, 2048  }
 0x430   : > { %5940 = vsyncadd (!%p5706_p5), %s4078_s8, 4294965248  ;;  %s18_s25 = sadd.s32 1, %s5971_s25   ;;  %s8452_s18 = smov %s5947_s19 }
 0x431   : > { %p15_p6 = scmp.ge.s32.totalorder %s18_s25, 6   ;;  %s8453_s19 = smov %s5951_s20 }
 0x432   : > { %s8454_s20 = smov %s6076_s11  ;;  %s8455_s21 = smov %s5963_s23 }
 0x433   : > { %s8456_s22 = smov %s5967_s24  ;;  %s8457_s23 = smov %s8460_s28 }
 0x434   : > { %s8458_s24 = smov %s8464_s29  ;;  %17 = sbr.rel (!%p15_p6) target bundleno = 5 (0x5), region = 84 }
 0x43b   :  { %4083 = vsyncpa [#allocation3], 1 }
 0x43c   :  { %4085 = vsyncpa [#allocation3 + $0x1], 1 }

</bundles_post_ra>
